<compile_context>
chip_gen: v5e
topology: v5e:2x2
jax: 0.10.0
libtpu: 0.0.40
codegen_flags: <defaults>
</compile_context>

<pallas_src>
import functools

import jax
import jax.numpy as jnp
from jax.experimental import pallas as pl
from jax.experimental.pallas import tpu as pltpu


CFG = dict(vocab=64, max_pos=32, type_vocab=2, hidden=32, heads=4,
           intermediate=64, layers=2, eps=1e-12)


# ----------------------------- kernel helpers -----------------------------

def _layernorm(x, g, b, eps):
    mean = jnp.mean(x, axis=-1, keepdims=True)
    xc = x - mean
    var = jnp.mean(xc * xc, axis=-1, keepdims=True)
    return xc * jax.lax.rsqrt(var + eps) * g + b


def _gelu(x):
    # TODO(synk): HF BERT uses exact erf-GELU; tanh approximation used here.
    c = 0.7978845608028654  # sqrt(2/pi)
    return 0.5 * x * (1.0 + jnp.tanh(c * (x + 0.044715 * x * x * x)))


# ----------------------------- fused kernel -----------------------------

def _bert_fused_kernel(
    x_emb_ref, mask_ref, emb_g_ref, emb_b_ref,
    qkv_w_ref, qkv_b_ref, o_w_ref, o_b_ref,
    fi_w_ref, fi_b_ref, fo_w_ref, fo_b_ref,
    ln1_g_ref, ln1_b_ref, ln2_g_ref, ln2_b_ref,
    pool_w_ref, pool_b_ref,
    pooled_ref,
    x_vmem,
    *, S, nH, dh, eps,
):
    layer = pl.program_id(1)
    n_layers = pl.num_programs(1)
    H = nH * dh

    # Grid step (b, 0): embedding LayerNorm for this batch element.
    @pl.when(layer == 0)
    def _():
        x_vmem[...] = _layernorm(x_emb_ref[...], emb_g_ref[...],
                                 emb_b_ref[...], eps)

    x = x_vmem[...]                                  # (S, H) f32, carried
    xb = x.astype(jnp.bfloat16)

    # ---- fused QKV projection: one heads-leading batched matmul ----
    # qkv_w: (3*nH, H, dh) bf16, Q|K|V stacked on the LEADING axis
    # (1/sqrt(dh) already folded into the Q slices at init).
    xh = jnp.broadcast_to(xb[None], (3 * nH, S, H))
    qkv = jnp.einsum('hsk,hkd->hsd', xh, qkv_w_ref[...],
                     preferred_element_type=jnp.float32) + qkv_b_ref[...]
    q = qkv[:nH]                                     # (nH, S, dh) - free leading-axis split
    k = qkv[nH:2 * nH]
    v = qkv[2 * nH:]

    # ---- attention: single batched dot over heads, additive mask bias ----
    s = jnp.einsum('hqd,hkd->hqk', q, k,
                   preferred_element_type=jnp.float32) + mask_ref[...]
    s = s - jnp.max(s, axis=-1, keepdims=True)
    p = jnp.exp(s)
    p = p * pl.reciprocal(jnp.sum(p, axis=-1, keepdims=True), approx=True)
    ctx = jnp.einsum('hqk,hkd->hqd', p, v,
                     preferred_element_type=jnp.float32)        # (nH, S, dh)

    # ---- output projection with head-merge folded in: sum_h ctx[h] @ Wo[h] ----
    o_heads = jnp.einsum('hsd,hdj->hsj', ctx.astype(jnp.bfloat16), o_w_ref[...],
                         preferred_element_type=jnp.float32)    # (nH, S, H)
    attn_out = jnp.sum(o_heads, axis=0) + o_b_ref[...]
    x = _layernorm(attn_out + x, ln1_g_ref[...], ln1_b_ref[...], eps)

    # ---- FFN + residual + LN2 ----
    h = jnp.dot(x.astype(jnp.bfloat16), fi_w_ref[...],
                preferred_element_type=jnp.float32) + fi_b_ref[...]
    h = _gelu(h)
    h = jnp.dot(h.astype(jnp.bfloat16), fo_w_ref[...],
                preferred_element_type=jnp.float32) + fo_b_ref[...]
    x = _layernorm(h + x, ln2_g_ref[...], ln2_b_ref[...], eps)

    x_vmem[...] = x                                  # carry to next layer

    # Last layer: pooler = tanh(dense(CLS)) written directly for this batch.
    @pl.when(layer == n_layers - 1)
    def _():
        cls = x[0:1, :]                              # (1, H) CLS row
        pooled = jnp.dot(cls, pool_w_ref[...],
                         preferred_element_type=jnp.float32) + pool_b_ref[...]
        pooled_ref[...] = jnp.tanh(pooled)


# ----------------------------- wrapper / glue -----------------------------

def _arr_bytes(a):
    return int(a.size) * a.dtype.itemsize


def bert_forward(params, input_ids, attention_mask, token_type_ids, cfg):
    B, S = input_ids.shape
    H, nH, I, L = cfg["hidden"], cfg["heads"], cfg["intermediate"], cfg["layers"]
    dh = H // nH

    # Embedding gathers (plain-JAX glue).
    we = jnp.take(params["word_emb"], input_ids, axis=0)           # (B,S,H)
    pe = params["pos_emb"][:S]                                     # (S,H)
    te = jnp.take(params["type_emb"], token_type_ids, axis=0)      # (B,S,H)
    x_emb = we + pe[None, :, :] + te                               # (B,S,H)

    # Precomputed additive mask bias: 0 where attended, -1e9 where masked.
    mask_bias = ((attention_mask.astype(jnp.float32) - 1.0) * 1e9).reshape(B, 1, S)

    def const_spec(shape):
        return pl.BlockSpec(shape, lambda b, l, _n=len(shape): (0,) * _n)

    def layer_spec(shape):      # leading dim = layer, squeezed out of the ref
        return pl.BlockSpec((None,) + shape[1:],
                            lambda b, l, _n=len(shape): (l,) + (0,) * (_n - 1))

    def batch_spec(shape):      # leading dim = batch, squeezed out of the ref
        return pl.BlockSpec((None,) + shape[1:],
                            lambda b, l, _n=len(shape): (b,) + (0,) * (_n - 1))

    kernel = functools.partial(_bert_fused_kernel,
                               S=S, nH=nH, dh=dh, eps=cfg["eps"])

    # Explicit scoped-VMEM limit sized from the actual resident buffers
    # (double-buffered blocks + scratch), with headroom.
    per_layer = sum(_arr_bytes(params[k]) // L for k in (
        "qkv_w", "qkv_b", "o_w", "o_b", "ffn_in_w", "ffn_in_b",
        "ffn_out_w", "ffn_out_b", "ln1_g", "ln1_b", "ln2_g", "ln2_b"))
    per_batch = (_arr_bytes(x_emb) + _arr_bytes(mask_bias)) // B
    consts = sum(_arr_bytes(params[k]) for k in
                 ("emb_ln_g", "emb_ln_b", "pooler_w", "pooler_b"))
    out_blk = H * 4
    scratch = S * H * 4
    resident = 2 * (per_layer + per_batch + consts + out_blk) + scratch
    vmem_limit = min(max(2 * resident, 4 * 1024 * 1024), 64 * 1024 * 1024)

    pooled = pl.pallas_call(
        kernel,
        grid=(B, L),
        in_specs=[
            batch_spec((B, S, H)),                  # x_emb
            batch_spec((B, 1, S)),                  # mask bias
            const_spec((1, H)),                     # emb_ln_g
            const_spec((1, H)),                     # emb_ln_b
            layer_spec((L, 3 * nH, H, dh)),         # qkv_w (heads-leading, Q|K|V stacked)
            layer_spec((L, 3 * nH, 1, dh)),         # qkv_b
            layer_spec((L, nH, dh, H)),             # o_w   (per-head blocks)
            layer_spec((L, 1, H)),                  # o_b
            layer_spec((L, H, I)),                  # ffn_in_w
            layer_spec((L, 1, I)),                  # ffn_in_b
            layer_spec((L, I, H)),                  # ffn_out_w
            layer_spec((L, 1, H)),                  # ffn_out_b
            layer_spec((L, 1, H)),                  # ln1_g
            layer_spec((L, 1, H)),                  # ln1_b
            layer_spec((L, 1, H)),                  # ln2_g
            layer_spec((L, 1, H)),                  # ln2_b
            const_spec((H, H)),                     # pooler_w
            const_spec((1, H)),                     # pooler_b
        ],
        out_specs=pl.BlockSpec((None, 1, H), lambda b, l: (b, 0, 0)),
        out_shape=jax.ShapeDtypeStruct((B, 1, H), jnp.float32),
        scratch_shapes=[pltpu.VMEM((S, H), jnp.float32)],
        compiler_params=pltpu.CompilerParams(
            # Batch axis independent -> parallel (feeds both v7x cores);
            # layer axis is a sequential carry -> arbitrary.
            dimension_semantics=("parallel", "arbitrary"),
            vmem_limit_bytes=int(vmem_limit)),
    )(
        x_emb, mask_bias,
        params["emb_ln_g"], params["emb_ln_b"],
        params["qkv_w"], params["qkv_b"], params["o_w"], params["o_b"],
        params["ffn_in_w"], params["ffn_in_b"],
        params["ffn_out_w"], params["ffn_out_b"],
        params["ln1_g"], params["ln1_b"], params["ln2_g"], params["ln2_b"],
        params["pooler_w"], params["pooler_b"],
    )
    return pooled.reshape(B, H)                                    # (B, H)


# ----------------------------- params -----------------------------

def init_params(key, cfg):
    H, I, L = cfg["hidden"], cfg["intermediate"], cfg["layers"]
    nH = cfg["heads"]
    dh = H // nH
    keys = iter(jax.random.split(key, 64))

    def w(k, fi, fo):
        return 0.02 * jax.random.normal(k, (fi, fo), jnp.float32)

    def to_heads(wm):                      # (H, H) -> (nH, H, dh) heads-leading
        return wm.reshape(H, nH, dh).transpose(1, 0, 2)

    p = {
        "word_emb": 0.02 * jax.random.normal(next(keys), (cfg["vocab"], H), jnp.float32),
        "pos_emb": 0.02 * jax.random.normal(next(keys), (cfg["max_pos"], H), jnp.float32),
        "type_emb": 0.02 * jax.random.normal(next(keys), (cfg["type_vocab"], H), jnp.float32),
        "emb_ln_g": jnp.ones((1, H), jnp.float32),
        "emb_ln_b": jnp.zeros((1, H), jnp.float32),
    }

    scale = 1.0 / (dh ** 0.5)              # attention scale folded into Q once
    qkv_w, o_w, fi_w, fo_w = [], [], [], []
    for _ in range(L):
        qw = w(next(keys), H, H) * scale
        kw = w(next(keys), H, H)
        vw = w(next(keys), H, H)
        qkv_w.append(jnp.concatenate([to_heads(qw), to_heads(kw), to_heads(vw)],
                                     axis=0))                      # (3nH, H, dh)
        o_w.append(w(next(keys), H, H).reshape(nH, dh, H))          # (nH, dh, H)
        fi_w.append(w(next(keys), H, I))
        fo_w.append(w(next(keys), I, H))

    # Stacked per-layer matmul weights in bf16 (f32 accumulation in-kernel).
    p["qkv_w"] = jnp.stack(qkv_w).astype(jnp.bfloat16)             # (L, 3nH, H, dh)
    p["qkv_b"] = jnp.zeros((L, 3 * nH, 1, dh), jnp.float32)        # scale-folded (zeros)
    p["o_w"] = jnp.stack(o_w).astype(jnp.bfloat16)                 # (L, nH, dh, H)
    p["o_b"] = jnp.zeros((L, 1, H), jnp.float32)
    p["ffn_in_w"] = jnp.stack(fi_w).astype(jnp.bfloat16)           # (L, H, I)
    p["ffn_in_b"] = jnp.zeros((L, 1, I), jnp.float32)
    p["ffn_out_w"] = jnp.stack(fo_w).astype(jnp.bfloat16)          # (L, I, H)
    p["ffn_out_b"] = jnp.zeros((L, 1, H), jnp.float32)
    p["ln1_g"] = jnp.ones((L, 1, H), jnp.float32)
    p["ln1_b"] = jnp.zeros((L, 1, H), jnp.float32)
    p["ln2_g"] = jnp.ones((L, 1, H), jnp.float32)
    p["ln2_b"] = jnp.zeros((L, 1, H), jnp.float32)
    p["pooler_w"] = w(next(keys), H, H)
    p["pooler_b"] = jnp.zeros((1, H), jnp.float32)
    return p


if __name__ == "__main__":
    cfg = CFG
    B, S = 2, 8
    key = jax.random.PRNGKey(0)
    k_param, k_ids = jax.random.split(key)

    params = init_params(k_param, cfg)
    input_ids = jax.random.randint(k_ids, (B, S), 0, cfg["vocab"], dtype=jnp.int32)
    attention_mask = jnp.array([[1, 1, 1, 1, 1, 1, 1, 1],
                                [1, 1, 1, 1, 1, 1, 0, 0]], dtype=jnp.int32)
    token_type_ids = jnp.zeros((B, S), dtype=jnp.int32)

    fwd = jax.jit(lambda p, ii, am, tt: bert_forward(p, ii, am, tt, CFG))
    pooled_output = fwd(params, input_ids, attention_mask, token_type_ids)
    jax.block_until_ready(pooled_output)
    assert pooled_output.shape == (B, cfg["hidden"])
    print("KERNEL_OK")
</pallas_src>

<mosaic_0001>
module attributes {stable_mosaic.version = 11 : i64} {
  func.func @_bert_fused_kernel(%arg0: i32, %arg1: i32, %arg2: memref<1x8x32xf32, #tpu.memory_space<vmem>>, %arg3: memref<1x1x8xf32, #tpu.memory_space<vmem>>, %arg4: memref<1x32xf32, #tpu.memory_space<vmem>>, %arg5: memref<1x32xf32, #tpu.memory_space<vmem>>, %arg6: memref<1x12x32x8xbf16, #tpu.memory_space<vmem>>, %arg7: memref<1x12x1x8xf32, #tpu.memory_space<vmem>>, %arg8: memref<1x4x8x32xbf16, #tpu.memory_space<vmem>>, %arg9: memref<1x1x32xf32, #tpu.memory_space<vmem>>, %arg10: memref<1x32x64xbf16, #tpu.memory_space<vmem>>, %arg11: memref<1x1x64xf32, #tpu.memory_space<vmem>>, %arg12: memref<1x64x32xbf16, #tpu.memory_space<vmem>>, %arg13: memref<1x1x32xf32, #tpu.memory_space<vmem>>, %arg14: memref<1x1x32xf32, #tpu.memory_space<vmem>>, %arg15: memref<1x1x32xf32, #tpu.memory_space<vmem>>, %arg16: memref<1x1x32xf32, #tpu.memory_space<vmem>>, %arg17: memref<1x1x32xf32, #tpu.memory_space<vmem>>, %arg18: memref<32x32xf32, #tpu.memory_space<vmem>>, %arg19: memref<1x32xf32, #tpu.memory_space<vmem>>, %arg20: memref<1x1x32xf32, #tpu.memory_space<vmem>>, %arg21: memref<8x32xf32, #tpu.memory_space<vmem>>) attributes {dimension_semantics = [#tpu.dimension_semantics<parallel>, #tpu.dimension_semantics<arbitrary>], iteration_bounds = array<i64: 2, 2>, scalar_prefetch = 0 : i64, scratch_operands = 1 : i64, tpu.core_type = #tpu.core_type<tc>, window_params = [{transform_indices = @transform_0, window_bounds = array<i64: 1, 8, 32>}, {transform_indices = @transform_1, window_bounds = array<i64: 1, 1, 8>}, {pipeline_mode = #tpu.pipeline_mode<synchronous>, transform_indices = @transform_2, window_bounds = array<i64: 1, 32>}, {pipeline_mode = #tpu.pipeline_mode<synchronous>, transform_indices = @transform_3, window_bounds = array<i64: 1, 32>}, {transform_indices = @transform_4, window_bounds = array<i64: 1, 12, 32, 8>}, {transform_indices = @transform_5, window_bounds = array<i64: 1, 12, 1, 8>}, {transform_indices = @transform_6, window_bounds = array<i64: 1, 4, 8, 32>}, {transform_indices = @transform_7, window_bounds = array<i64: 1, 1, 32>}, {transform_indices = @transform_8, window_bounds = array<i64: 1, 32, 64>}, {transform_indices = @transform_9, window_bounds = array<i64: 1, 1, 64>}, {transform_indices = @transform_10, window_bounds = array<i64: 1, 64, 32>}, {transform_indices = @transform_11, window_bounds = array<i64: 1, 1, 32>}, {transform_indices = @transform_12, window_bounds = array<i64: 1, 1, 32>}, {transform_indices = @transform_13, window_bounds = array<i64: 1, 1, 32>}, {transform_indices = @transform_14, window_bounds = array<i64: 1, 1, 32>}, {transform_indices = @transform_15, window_bounds = array<i64: 1, 1, 32>}, {pipeline_mode = #tpu.pipeline_mode<synchronous>, transform_indices = @transform_16, window_bounds = array<i64: 32, 32>}, {pipeline_mode = #tpu.pipeline_mode<synchronous>, transform_indices = @transform_17, window_bounds = array<i64: 1, 32>}, {transform_indices = @transform_18, window_bounds = array<i64: 1, 1, 32>}]} {
    %c0_i32 = arith.constant 0 : i32
    %0 = arith.cmpi eq, %arg1, %c0_i32 : i32
    %1 = arith.extui %0 : i1 to i32
    %c0_i32_0 = arith.constant 0 : i32
    %2 = arith.cmpi ne, %1, %c0_i32_0 : i32
    scf.if %2 {
      %c0_69 = arith.constant 0 : index
      %c0_70 = arith.constant 0 : index
      %c0_71 = arith.constant 0 : index
      %127 = vector.load %arg2[%c0_69, %c0_70, %c0_71] : memref<1x8x32xf32, #tpu.memory_space<vmem>>, vector<1x8x32xf32>
      %128 = vector.shape_cast %127 : vector<1x8x32xf32> to vector<8x32xf32>
      %c0_72 = arith.constant 0 : index
      %c0_73 = arith.constant 0 : index
      %129 = vector.load %arg4[%c0_72, %c0_73] : memref<1x32xf32, #tpu.memory_space<vmem>>, vector<1x32xf32>
      %c0_74 = arith.constant 0 : index
      %c0_75 = arith.constant 0 : index
      %130 = vector.load %arg5[%c0_74, %c0_75] : memref<1x32xf32, #tpu.memory_space<vmem>>, vector<1x32xf32>
      %cst_76 = arith.constant dense<0.000000e+00> : vector<8xf32>
      %131 = vector.multi_reduction <add>, %128, %cst_76 [1] : vector<8x32xf32> to vector<8xf32>
      %132 = vector.shape_cast %131 : vector<8xf32> to vector<8x1xf32>
      %cst_77 = arith.constant 3.200000e+01 : f32
      %133 = vector.broadcast %cst_77 : f32 to vector<8x1xf32>
      %134 = arith.divf %132, %133 : vector<8x1xf32>
      %135 = vector.broadcast %134 : vector<8x1xf32> to vector<8x32xf32>
      %136 = arith.subf %128, %135 : vector<8x32xf32>
      %137 = arith.mulf %136, %136 : vector<8x32xf32>
      %cst_78 = arith.constant dense<0.000000e+00> : vector<8xf32>
      %138 = vector.multi_reduction <add>, %137, %cst_78 [1] : vector<8x32xf32> to vector<8xf32>
      %139 = vector.shape_cast %138 : vector<8xf32> to vector<8x1xf32>
      %cst_79 = arith.constant 3.200000e+01 : f32
      %140 = vector.broadcast %cst_79 : f32 to vector<8x1xf32>
      %141 = arith.divf %139, %140 : vector<8x1xf32>
      %cst_80 = arith.constant 9.99999996E-13 : f32
      %142 = vector.broadcast %cst_80 : f32 to vector<8x1xf32>
      %143 = arith.addf %141, %142 : vector<8x1xf32>
      %144 = math.rsqrt %143 : vector<8x1xf32>
      %145 = vector.broadcast %144 : vector<8x1xf32> to vector<8x32xf32>
      %146 = arith.mulf %136, %145 : vector<8x32xf32>
      %147 = vector.broadcast %129 : vector<1x32xf32> to vector<8x32xf32>
      %148 = arith.mulf %146, %147 : vector<8x32xf32>
      %149 = vector.broadcast %130 : vector<1x32xf32> to vector<8x32xf32>
      %150 = arith.addf %148, %149 : vector<8x32xf32>
      %c0_81 = arith.constant 0 : index
      %c0_82 = arith.constant 0 : index
      %151 = vector.load %arg21[%c0_81, %c0_82] : memref<8x32xf32, #tpu.memory_space<vmem>>, vector<8x32xf32>
      tpu.vector_store %arg21[%c0_81, %c0_82], %150 {strides = array<i32>} : memref<8x32xf32, #tpu.memory_space<vmem>>, vector<8x32xf32>,
    } else {
    }
    %c0 = arith.constant 0 : index
    %c0_1 = arith.constant 0 : index
    %3 = vector.load %arg21[%c0, %c0_1] : memref<8x32xf32, #tpu.memory_space<vmem>>, vector<8x32xf32>
    %4 = arith.truncf %3 : vector<8x32xf32> to vector<8x32xbf16>
    %5 = vector.shape_cast %4 : vector<8x32xbf16> to vector<1x8x32xbf16>
    %6 = vector.shape_cast %5 : vector<1x8x32xbf16> to vector<1x8x32xbf16>
    %7 = vector.broadcast %6 : vector<1x8x32xbf16> to vector<12x8x32xbf16>
    %c0_2 = arith.constant 0 : index
    %c0_3 = arith.constant 0 : index
    %c0_4 = arith.constant 0 : index
    %c0_5 = arith.constant 0 : index
    %8 = vector.load %arg6[%c0_2, %c0_3, %c0_4, %c0_5] : memref<1x12x32x8xbf16, #tpu.memory_space<vmem>>, vector<1x12x32x8xbf16>
    %9 = vector.shape_cast %8 : vector<1x12x32x8xbf16> to vector<12x32x8xbf16>
    "tpu.trace_start"() <{level = 10 : i32, message = "hsk,hkd->hsd"}> : () -> ()
    %cst = arith.constant dense<0.000000e+00> : vector<12x8x8xf32>
    %10 = tpu.matmul %7, %9, %cst {dimension_numbers = #tpu.dot_dimension_numbers<[2], [1], [1], [2], [0, 0, 0, 1, 1, 2], [0], [0]>} : vector<12x8x32xbf16>, vector<12x32x8xbf16>, vector<12x8x8xf32> -> vector<12x8x8xf32>
    "tpu.trace_stop"() : () -> ()
    %c0_6 = arith.constant 0 : index
    %c0_7 = arith.constant 0 : index
    %c0_8 = arith.constant 0 : index
    %c0_9 = arith.constant 0 : index
    %11 = vector.load %arg7[%c0_6, %c0_7, %c0_8, %c0_9] : memref<1x12x1x8xf32, #tpu.memory_space<vmem>>, vector<1x12x1x8xf32>
    %12 = vector.shape_cast %11 : vector<1x12x1x8xf32> to vector<12x1x8xf32>
    %13 = vector.broadcast %12 : vector<12x1x8xf32> to vector<12x8x8xf32>
    %14 = arith.addf %10, %13 : vector<12x8x8xf32>
    %15 = vector.extract_strided_slice %14 {offsets = [0, 0, 0], sizes = [4, 8, 8], strides = [1, 1, 1]} : vector<12x8x8xf32> to vector<4x8x8xf32>
    %16 = vector.extract_strided_slice %14 {offsets = [4, 0, 0], sizes = [4, 8, 8], strides = [1, 1, 1]} : vector<12x8x8xf32> to vector<4x8x8xf32>
    %17 = vector.extract_strided_slice %14 {offsets = [8, 0, 0], sizes = [4, 8, 8], strides = [1, 1, 1]} : vector<12x8x8xf32> to vector<4x8x8xf32>
    "tpu.trace_start"() <{level = 10 : i32, message = "hqd,hkd->hqk"}> : () -> ()
    %cst_10 = arith.constant dense<0.000000e+00> : vector<4x8x8xf32>
    %18 = tpu.matmul %15, %16, %cst_10 {dimension_numbers = #tpu.dot_dimension_numbers<[2], [2], [1], [1], [0, 0, 0, 1, 1, 1], [0], [0]>} : vector<4x8x8xf32>, vector<4x8x8xf32>, vector<4x8x8xf32> -> vector<4x8x8xf32>
    "tpu.trace_stop"() : () -> ()
    %c0_11 = arith.constant 0 : index
    %c0_12 = arith.constant 0 : index
    %c0_13 = arith.constant 0 : index
    %19 = vector.load %arg3[%c0_11, %c0_12, %c0_13] : memref<1x1x8xf32, #tpu.memory_space<vmem>>, vector<1x1x8xf32>
    %20 = vector.shape_cast %19 : vector<1x1x8xf32> to vector<1x8xf32>
    %21 = vector.shape_cast %20 : vector<1x8xf32> to vector<1x1x8xf32>
    %22 = vector.broadcast %21 : vector<1x1x8xf32> to vector<4x8x8xf32>
    %23 = arith.addf %18, %22 : vector<4x8x8xf32>
    %cst_14 = arith.constant dense<0xFF800000> : vector<4x8xf32>
    %24 = vector.multi_reduction <maximumf>, %23, %cst_14 [2] : vector<4x8x8xf32> to vector<4x8xf32>
    %25 = vector.shape_cast %24 : vector<4x8xf32> to vector<4x8x1xf32>
    %26 = vector.broadcast %25 : vector<4x8x1xf32> to vector<4x8x8xf32>
    %27 = arith.subf %23, %26 : vector<4x8x8xf32>
    %28 = math.exp %27 : vector<4x8x8xf32>
    %cst_15 = arith.constant dense<0.000000e+00> : vector<4x8xf32>
    %29 = vector.multi_reduction <add>, %28, %cst_15 [2] : vector<4x8x8xf32> to vector<4x8xf32>
    %30 = vector.shape_cast %29 : vector<4x8xf32> to vector<4x8x1xf32>
    %31 = tpu.reciprocal %30 {approx = true} : vector<4x8x1xf32> -> vector<4x8x1xf32>
    %32 = vector.broadcast %31 : vector<4x8x1xf32> to vector<4x8x8xf32>
    %33 = arith.mulf %28, %32 : vector<4x8x8xf32>
    "tpu.trace_start"() <{level = 10 : i32, message = "hqk,hkd->hqd"}> : () -> ()
    %cst_16 = arith.constant dense<0.000000e+00> : vector<4x8x8xf32>
    %34 = tpu.matmul %33, %17, %cst_16 {dimension_numbers = #tpu.dot_dimension_numbers<[2], [1], [1], [2], [0, 0, 0, 1, 1, 2], [0], [0]>} : vector<4x8x8xf32>, vector<4x8x8xf32>, vector<4x8x8xf32> -> vector<4x8x8xf32>
    "tpu.trace_stop"() : () -> ()
    %35 = arith.truncf %34 : vector<4x8x8xf32> to vector<4x8x8xbf16>
    %c0_17 = arith.constant 0 : index
    %c0_18 = arith.constant 0 : index
    %c0_19 = arith.constant 0 : index
    %c0_20 = arith.constant 0 : index
    %36 = vector.load %arg8[%c0_17, %c0_18, %c0_19, %c0_20] : memref<1x4x8x32xbf16, #tpu.memory_space<vmem>>, vector<1x4x8x32xbf16>
    %37 = vector.shape_cast %36 : vector<1x4x8x32xbf16> to vector<4x8x32xbf16>
    "tpu.trace_start"() <{level = 10 : i32, message = "hsd,hdj->hsj"}> : () -> ()
    %cst_21 = arith.constant dense<0.000000e+00> : vector<4x8x32xf32>
    %38 = tpu.matmul %35, %37, %cst_21 {dimension_numbers = #tpu.dot_dimension_numbers<[2], [1], [1], [2], [0, 0, 0, 1, 1, 2], [0], [0]>} : vector<4x8x8xbf16>, vector<4x8x32xbf16>, vector<4x8x32xf32> -> vector<4x8x32xf32>
    "tpu.trace_stop"() : () -> ()
    %cst_22 = arith.constant dense<0.000000e+00> : vector<8x32xf32>
    %39 = vector.multi_reduction <add>, %38, %cst_22 [0] : vector<4x8x32xf32> to vector<8x32xf32>
    %c0_23 = arith.constant 0 : index
    %c0_24 = arith.constant 0 : index
    %c0_25 = arith.constant 0 : index
    %40 = vector.load %arg9[%c0_23, %c0_24, %c0_25] : memref<1x1x32xf32, #tpu.memory_space<vmem>>, vector<1x1x32xf32>
    %41 = vector.shape_cast %40 : vector<1x1x32xf32> to vector<1x32xf32>
    %42 = vector.broadcast %41 : vector<1x32xf32> to vector<8x32xf32>
    %43 = arith.addf %39, %42 : vector<8x32xf32>
    %44 = arith.addf %43, %3 : vector<8x32xf32>
    %c0_26 = arith.constant 0 : index
    %c0_27 = arith.constant 0 : index
    %c0_28 = arith.constant 0 : index
    %45 = vector.load %arg14[%c0_26, %c0_27, %c0_28] : memref<1x1x32xf32, #tpu.memory_space<vmem>>, vector<1x1x32xf32>
    %46 = vector.shape_cast %45 : vector<1x1x32xf32> to vector<1x32xf32>
    %c0_29 = arith.constant 0 : index
    %c0_30 = arith.constant 0 : index
    %c0_31 = arith.constant 0 : index
    %47 = vector.load %arg15[%c0_29, %c0_30, %c0_31] : memref<1x1x32xf32, #tpu.memory_space<vmem>>, vector<1x1x32xf32>
    %48 = vector.shape_cast %47 : vector<1x1x32xf32> to vector<1x32xf32>
    %cst_32 = arith.constant dense<0.000000e+00> : vector<8xf32>
    %49 = vector.multi_reduction <add>, %44, %cst_32 [1] : vector<8x32xf32> to vector<8xf32>
    %50 = vector.shape_cast %49 : vector<8xf32> to vector<8x1xf32>
    %cst_33 = arith.constant 3.200000e+01 : f32
    %51 = vector.broadcast %cst_33 : f32 to vector<8x1xf32>
    %52 = arith.divf %50, %51 : vector<8x1xf32>
    %53 = vector.broadcast %52 : vector<8x1xf32> to vector<8x32xf32>
    %54 = arith.subf %44, %53 : vector<8x32xf32>
    %55 = arith.mulf %54, %54 : vector<8x32xf32>
    %cst_34 = arith.constant dense<0.000000e+00> : vector<8xf32>
    %56 = vector.multi_reduction <add>, %55, %cst_34 [1] : vector<8x32xf32> to vector<8xf32>
    %57 = vector.shape_cast %56 : vector<8xf32> to vector<8x1xf32>
    %cst_35 = arith.constant 3.200000e+01 : f32
    %58 = vector.broadcast %cst_35 : f32 to vector<8x1xf32>
    %59 = arith.divf %57, %58 : vector<8x1xf32>
    %cst_36 = arith.constant 9.99999996E-13 : f32
    %60 = vector.broadcast %cst_36 : f32 to vector<8x1xf32>
    %61 = arith.addf %59, %60 : vector<8x1xf32>
    %62 = math.rsqrt %61 : vector<8x1xf32>
    %63 = vector.broadcast %62 : vector<8x1xf32> to vector<8x32xf32>
    %64 = arith.mulf %54, %63 : vector<8x32xf32>
    %65 = vector.broadcast %46 : vector<1x32xf32> to vector<8x32xf32>
    %66 = arith.mulf %64, %65 : vector<8x32xf32>
    %67 = vector.broadcast %48 : vector<1x32xf32> to vector<8x32xf32>
    %68 = arith.addf %66, %67 : vector<8x32xf32>
    %69 = arith.truncf %68 : vector<8x32xf32> to vector<8x32xbf16>
    %c0_37 = arith.constant 0 : index
    %c0_38 = arith.constant 0 : index
    %c0_39 = arith.constant 0 : index
    %70 = vector.load %arg10[%c0_37, %c0_38, %c0_39] : memref<1x32x64xbf16, #tpu.memory_space<vmem>>, vector<1x32x64xbf16>
    %71 = vector.shape_cast %70 : vector<1x32x64xbf16> to vector<32x64xbf16>
    %cst_40 = arith.constant dense<0.000000e+00> : vector<8x64xf32>
    %72 = tpu.matmul %69, %71, %cst_40 {dimension_numbers = #tpu.dot_dimension_numbers<[1], [0], [0], [1], [0, 0, 1, 1], [], []>} : vector<8x32xbf16>, vector<32x64xbf16>, vector<8x64xf32> -> vector<8x64xf32>
    %c0_41 = arith.constant 0 : index
    %c0_42 = arith.constant 0 : index
    %c0_43 = arith.constant 0 : index
    %73 = vector.load %arg11[%c0_41, %c0_42, %c0_43] : memref<1x1x64xf32, #tpu.memory_space<vmem>>, vector<1x1x64xf32>
    %74 = vector.shape_cast %73 : vector<1x1x64xf32> to vector<1x64xf32>
    %75 = vector.broadcast %74 : vector<1x64xf32> to vector<8x64xf32>
    %76 = arith.addf %72, %75 : vector<8x64xf32>
    %cst_44 = arith.constant 5.000000e-01 : f32
    %77 = vector.broadcast %cst_44 : f32 to vector<8x64xf32>
    %78 = arith.mulf %77, %76 : vector<8x64xf32>
    %cst_45 = arith.constant 4.471500e-02 : f32
    %79 = vector.broadcast %cst_45 : f32 to vector<8x64xf32>
    %80 = arith.mulf %79, %76 : vector<8x64xf32>
    %81 = arith.mulf %80, %76 : vector<8x64xf32>
    %82 = arith.mulf %81, %76 : vector<8x64xf32>
    %83 = arith.addf %76, %82 : vector<8x64xf32>
    %cst_46 = arith.constant 0.797884583 : f32
    %84 = vector.broadcast %cst_46 : f32 to vector<8x64xf32>
    %85 = arith.mulf %84, %83 : vector<8x64xf32>
    %86 = math.tanh %85 : vector<8x64xf32>
    %cst_47 = arith.constant 1.000000e+00 : f32
    %87 = vector.broadcast %cst_47 : f32 to vector<8x64xf32>
    %88 = arith.addf %87, %86 : vector<8x64xf32>
    %89 = arith.mulf %78, %88 : vector<8x64xf32>
    %90 = arith.truncf %89 : vector<8x64xf32> to vector<8x64xbf16>
    %c0_48 = arith.constant 0 : index
    %c0_49 = arith.constant 0 : index
    %c0_50 = arith.constant 0 : index
    %91 = vector.load %arg12[%c0_48, %c0_49, %c0_50] : memref<1x64x32xbf16, #tpu.memory_space<vmem>>, vector<1x64x32xbf16>
    %92 = vector.shape_cast %91 : vector<1x64x32xbf16> to vector<64x32xbf16>
    %cst_51 = arith.constant dense<0.000000e+00> : vector<8x32xf32>
    %93 = tpu.matmul %90, %92, %cst_51 {dimension_numbers = #tpu.dot_dimension_numbers<[1], [0], [0], [1], [0, 0, 1, 1], [], []>} : vector<8x64xbf16>, vector<64x32xbf16>, vector<8x32xf32> -> vector<8x32xf32>
    %c0_52 = arith.constant 0 : index
    %c0_53 = arith.constant 0 : index
    %c0_54 = arith.constant 0 : index
    %94 = vector.load %arg13[%c0_52, %c0_53, %c0_54] : memref<1x1x32xf32, #tpu.memory_space<vmem>>, vector<1x1x32xf32>
    %95 = vector.shape_cast %94 : vector<1x1x32xf32> to vector<1x32xf32>
    %96 = vector.broadcast %95 : vector<1x32xf32> to vector<8x32xf32>
    %97 = arith.addf %93, %96 : vector<8x32xf32>
    %98 = arith.addf %97, %68 : vector<8x32xf32>
    %c0_55 = arith.constant 0 : index
    %c0_56 = arith.constant 0 : index
    %c0_57 = arith.constant 0 : index
    %99 = vector.load %arg16[%c0_55, %c0_56, %c0_57] : memref<1x1x32xf32, #tpu.memory_space<vmem>>, vector<1x1x32xf32>
    %100 = vector.shape_cast %99 : vector<1x1x32xf32> to vector<1x32xf32>
    %c0_58 = arith.constant 0 : index
    %c0_59 = arith.constant 0 : index
    %c0_60 = arith.constant 0 : index
    %101 = vector.load %arg17[%c0_58, %c0_59, %c0_60] : memref<1x1x32xf32, #tpu.memory_space<vmem>>, vector<1x1x32xf32>
    %102 = vector.shape_cast %101 : vector<1x1x32xf32> to vector<1x32xf32>
    %cst_61 = arith.constant dense<0.000000e+00> : vector<8xf32>
    %103 = vector.multi_reduction <add>, %98, %cst_61 [1] : vector<8x32xf32> to vector<8xf32>
    %104 = vector.shape_cast %103 : vector<8xf32> to vector<8x1xf32>
    %cst_62 = arith.constant 3.200000e+01 : f32
    %105 = vector.broadcast %cst_62 : f32 to vector<8x1xf32>
    %106 = arith.divf %104, %105 : vector<8x1xf32>
    %107 = vector.broadcast %106 : vector<8x1xf32> to vector<8x32xf32>
    %108 = arith.subf %98, %107 : vector<8x32xf32>
    %109 = arith.mulf %108, %108 : vector<8x32xf32>
    %cst_63 = arith.constant dense<0.000000e+00> : vector<8xf32>
    %110 = vector.multi_reduction <add>, %109, %cst_63 [1] : vector<8x32xf32> to vector<8xf32>
    %111 = vector.shape_cast %110 : vector<8xf32> to vector<8x1xf32>
    %cst_64 = arith.constant 3.200000e+01 : f32
    %112 = vector.broadcast %cst_64 : f32 to vector<8x1xf32>
    %113 = arith.divf %111, %112 : vector<8x1xf32>
    %cst_65 = arith.constant 9.99999996E-13 : f32
    %114 = vector.broadcast %cst_65 : f32 to vector<8x1xf32>
    %115 = arith.addf %113, %114 : vector<8x1xf32>
    %116 = math.rsqrt %115 : vector<8x1xf32>
    %117 = vector.broadcast %116 : vector<8x1xf32> to vector<8x32xf32>
    %118 = arith.mulf %108, %117 : vector<8x32xf32>
    %119 = vector.broadcast %100 : vector<1x32xf32> to vector<8x32xf32>
    %120 = arith.mulf %118, %119 : vector<8x32xf32>
    %121 = vector.broadcast %102 : vector<1x32xf32> to vector<8x32xf32>
    %122 = arith.addf %120, %121 : vector<8x32xf32>
    %c0_66 = arith.constant 0 : index
    %c0_67 = arith.constant 0 : index
    %123 = vector.load %arg21[%c0_66, %c0_67] : memref<8x32xf32, #tpu.memory_space<vmem>>, vector<8x32xf32>
    tpu.vector_store %arg21[%c0_66, %c0_67], %122 {strides = array<i32>} : memref<8x32xf32, #tpu.memory_space<vmem>>, vector<8x32xf32>,
    %c1_i32 = arith.constant 1 : i32
    %124 = arith.cmpi eq, %arg1, %c1_i32 : i32
    %125 = arith.extui %124 : i1 to i32
    %c0_i32_68 = arith.constant 0 : i32
    %126 = arith.cmpi ne, %125, %c0_i32_68 : i32
    scf.if %126 {
      %127 = vector.extract_strided_slice %122 {offsets = [0, 0], sizes = [1, 32], strides = [1, 1]} : vector<8x32xf32> to vector<1x32xf32>
      %c0_69 = arith.constant 0 : index
      %c0_70 = arith.constant 0 : index
      %128 = vector.load %arg18[%c0_69, %c0_70] : memref<32x32xf32, #tpu.memory_space<vmem>>, vector<32x32xf32>
      %cst_71 = arith.constant dense<0.000000e+00> : vector<1x32xf32>
      %129 = tpu.matmul %127, %128, %cst_71 {dimension_numbers = #tpu.dot_dimension_numbers<[1], [0], [0], [1], [0, 0, 1, 1], [], []>} : vector<1x32xf32>, vector<32x32xf32>, vector<1x32xf32> -> vector<1x32xf32>
      %c0_72 = arith.constant 0 : index
      %c0_73 = arith.constant 0 : index
      %130 = vector.load %arg19[%c0_72, %c0_73] : memref<1x32xf32, #tpu.memory_space<vmem>>, vector<1x32xf32>
      %131 = arith.addf %129, %130 : vector<1x32xf32>
      %132 = math.tanh %131 : vector<1x32xf32>
      %c0_74 = arith.constant 0 : index
      %c0_75 = arith.constant 0 : index
      %c0_76 = arith.constant 0 : index
      %133 = vector.load %arg20[%c0_74, %c0_75, %c0_76] : memref<1x1x32xf32, #tpu.memory_space<vmem>>, vector<1x1x32xf32>
      %134 = vector.shape_cast %133 : vector<1x1x32xf32> to vector<1x32xf32>
      %135 = vector.shape_cast %132 : vector<1x32xf32> to vector<1x1x32xf32>
      tpu.vector_store %arg20[%c0_74, %c0_75, %c0_76], %135 {strides = array<i32>} : memref<1x1x32xf32, #tpu.memory_space<vmem>>, vector<1x1x32xf32>,
    } else {
    }
    return
  }
  func.func @transform_0(%arg0: i32, %arg1: i32) -> (i32, i32, i32) {
    %c0_i32 = arith.constant 0 : i32
    %c0_i32_0 = arith.constant 0 : i32
    %c0_i32_1 = arith.constant 0 : i32
    return %arg0, %c0_i32, %c0_i32_0 : i32, i32, i32
  }
  func.func @transform_1(%arg0: i32, %arg1: i32) -> (i32, i32, i32) {
    %c0_i32 = arith.constant 0 : i32
    %c0_i32_0 = arith.constant 0 : i32
    %c0_i32_1 = arith.constant 0 : i32
    return %arg0, %c0_i32, %c0_i32_0 : i32, i32, i32
  }
  func.func @transform_2(%arg0: i32, %arg1: i32) -> (i32, i32) {
    %c0_i32 = arith.constant 0 : i32
    %c0_i32_0 = arith.constant 0 : i32
    %c0_i32_1 = arith.constant 0 : i32
    return %c0_i32, %c0_i32_0 : i32, i32
  }
  func.func @transform_3(%arg0: i32, %arg1: i32) -> (i32, i32) {
    %c0_i32 = arith.constant 0 : i32
    %c0_i32_0 = arith.constant 0 : i32
    %c0_i32_1 = arith.constant 0 : i32
    return %c0_i32, %c0_i32_0 : i32, i32
  }
  func.func @transform_4(%arg0: i32, %arg1: i32) -> (i32, i32, i32, i32) {
    %c0_i32 = arith.constant 0 : i32
    %c0_i32_0 = arith.constant 0 : i32
    %c0_i32_1 = arith.constant 0 : i32
    %c0_i32_2 = arith.constant 0 : i32
    return %arg1, %c0_i32, %c0_i32_0, %c0_i32_1 : i32, i32, i32, i32
  }
  func.func @transform_5(%arg0: i32, %arg1: i32) -> (i32, i32, i32, i32) {
    %c0_i32 = arith.constant 0 : i32
    %c0_i32_0 = arith.constant 0 : i32
    %c0_i32_1 = arith.constant 0 : i32
    %c0_i32_2 = arith.constant 0 : i32
    return %arg1, %c0_i32, %c0_i32_0, %c0_i32_1 : i32, i32, i32, i32
  }
  func.func @transform_6(%arg0: i32, %arg1: i32) -> (i32, i32, i32, i32) {
    %c0_i32 = arith.constant 0 : i32
    %c0_i32_0 = arith.constant 0 : i32
    %c0_i32_1 = arith.constant 0 : i32
    %c0_i32_2 = arith.constant 0 : i32
    return %arg1, %c0_i32, %c0_i32_0, %c0_i32_1 : i32, i32, i32, i32
  }
  func.func @transform_7(%arg0: i32, %arg1: i32) -> (i32, i32, i32) {
    %c0_i32 = arith.constant 0 : i32
    %c0_i32_0 = arith.constant 0 : i32
    %c0_i32_1 = arith.constant 0 : i32
    return %arg1, %c0_i32, %c0_i32_0 : i32, i32, i32
  }
  func.func @transform_8(%arg0: i32, %arg1: i32) -> (i32, i32, i32) {
    %c0_i32 = arith.constant 0 : i32
    %c0_i32_0 = arith.constant 0 : i32
    %c0_i32_1 = arith.constant 0 : i32
    return %arg1, %c0_i32, %c0_i32_0 : i32, i32, i32
  }
  func.func @transform_9(%arg0: i32, %arg1: i32) -> (i32, i32, i32) {
    %c0_i32 = arith.constant 0 : i32
    %c0_i32_0 = arith.constant 0 : i32
    %c0_i32_1 = arith.constant 0 : i32
    return %arg1, %c0_i32, %c0_i32_0 : i32, i32, i32
  }
  func.func @transform_10(%arg0: i32, %arg1: i32) -> (i32, i32, i32) {
    %c0_i32 = arith.constant 0 : i32
    %c0_i32_0 = arith.constant 0 : i32
    %c0_i32_1 = arith.constant 0 : i32
    return %arg1, %c0_i32, %c0_i32_0 : i32, i32, i32
  }
  func.func @transform_11(%arg0: i32, %arg1: i32) -> (i32, i32, i32) {
    %c0_i32 = arith.constant 0 : i32
    %c0_i32_0 = arith.constant 0 : i32
    %c0_i32_1 = arith.constant 0 : i32
    return %arg1, %c0_i32, %c0_i32_0 : i32, i32, i32
  }
  func.func @transform_12(%arg0: i32, %arg1: i32) -> (i32, i32, i32) {
    %c0_i32 = arith.constant 0 : i32
    %c0_i32_0 = arith.constant 0 : i32
    %c0_i32_1 = arith.constant 0 : i32
    return %arg1, %c0_i32, %c0_i32_0 : i32, i32, i32
  }
  func.func @transform_13(%arg0: i32, %arg1: i32) -> (i32, i32, i32) {
    %c0_i32 = arith.constant 0 : i32
    %c0_i32_0 = arith.constant 0 : i32
    %c0_i32_1 = arith.constant 0 : i32
    return %arg1, %c0_i32, %c0_i32_0 : i32, i32, i32
  }
  func.func @transform_14(%arg0: i32, %arg1: i32) -> (i32, i32, i32) {
    %c0_i32 = arith.constant 0 : i32
    %c0_i32_0 = arith.constant 0 : i32
    %c0_i32_1 = arith.constant 0 : i32
    return %arg1, %c0_i32, %c0_i32_0 : i32, i32, i32
  }
  func.func @transform_15(%arg0: i32, %arg1: i32) -> (i32, i32, i32) {
    %c0_i32 = arith.constant 0 : i32
    %c0_i32_0 = arith.constant 0 : i32
    %c0_i32_1 = arith.constant 0 : i32
    return %arg1, %c0_i32, %c0_i32_0 : i32, i32, i32
  }
  func.func @transform_16(%arg0: i32, %arg1: i32) -> (i32, i32) {
    %c0_i32 = arith.constant 0 : i32
    %c0_i32_0 = arith.constant 0 : i32
    %c0_i32_1 = arith.constant 0 : i32
    return %c0_i32, %c0_i32_0 : i32, i32
  }
  func.func @transform_17(%arg0: i32, %arg1: i32) -> (i32, i32) {
    %c0_i32 = arith.constant 0 : i32
    %c0_i32_0 = arith.constant 0 : i32
    %c0_i32_1 = arith.constant 0 : i32
    return %c0_i32, %c0_i32_0 : i32, i32
  }
  func.func @transform_18(%arg0: i32, %arg1: i32) -> (i32, i32, i32) {
    %c0_i32 = arith.constant 0 : i32
    %c0_i32_0 = arith.constant 0 : i32
    %c0_i32_1 = arith.constant 0 : i32
    return %arg0, %c0_i32, %c0_i32_0 : i32, i32, i32
  }
}

</mosaic_0001>

<bundles_post_ra>
// kernel: _lambda_.1
= control target key start
LH: loop header
LB: loop body
LE: loop exit
PB: predicated region body
PF: predicated region fallthrough
CT: control target
= control target key end

     0   :  { %s2900_s0 = inlined_call_operand.vmem [shape: f32[2,8,32], index: 0, kind: input, shape index: {}]   ;;  %s2901_s1 = inlined_call_operand.vmem [shape: f32[2,1,8], index: 1, kind: input, shape index: {}]   ;;  %s2902_s2 = inlined_call_operand.vmem [shape: f32[1,32], index: 2, kind: input, shape index: {}]   ;;  %s2903_s3 = inlined_call_operand.vmem [shape: f32[1,32], index: 3, kind: input, shape index: {}]   ;;  %s2904_s4 = inlined_call_operand.vmem [shape: bf16[2,12,32,8], index: 4, kind: input, shape index: {}]   ;;  %s2905_s5 = inlined_call_operand.vmem [shape: f32[2,12,1,8], index: 5, kind: input, shape index: {}]   ;;  %s2906_s6 = inlined_call_operand.vmem [shape: bf16[2,4,8,32], index: 6, kind: input, shape index: {}]   ;;  %s2907_s7 = inlined_call_operand.vmem [shape: f32[2,1,32], index: 7, kind: input, shape index: {}]   ;;  %s2908_s8 = inlined_call_operand.vmem [shape: bf16[2,32,64], index: 8, kind: input, shape index: {}]   ;;  %s2909_s9 = inlined_call_operand.vmem [shape: f32[2,1,64], index: 9, kind: input, shape index: {}]   ;;  %s2910_s10 = inlined_call_operand.vmem [shape: bf16[2,64,32], index: 10, kind: input, shape index: {}]   ;;  %s2911_s11 = inlined_call_operand.vmem [shape: f32[2,1,32], index: 11, kind: input, shape index: {}]   ;;  %s2912_s12 = inlined_call_operand.vmem [shape: f32[2,1,32], index: 12, kind: input, shape index: {}]   ;;  %s2913_s13 = inlined_call_operand.vmem [shape: f32[2,1,32], index: 13, kind: input, shape index: {}]   ;;  %s2914_s14 = inlined_call_operand.vmem [shape: f32[2,1,32], index: 14, kind: input, shape index: {}]   ;;  %s2915_s15 = inlined_call_operand.vmem [shape: f32[2,1,32], index: 15, kind: input, shape index: {}]   ;;  %s2916_s16 = inlined_call_operand.vmem [shape: f32[32,32], index: 16, kind: input, shape index: {}]   ;;  %s2917_s17 = inlined_call_operand.vmem [shape: f32[1,32], index: 17, kind: input, shape index: {}]   ;;  %s2918_s18 = inlined_call_operand.hbm [shape: f32[2,1,32], index: 18, kind: output, shape index: {}]  }
   0x1   :  { %2934 = sst [smem:[#allocation19_spill]] %s2900_s0 }
   0x2   :  { %2935 = sst [smem:[#allocation20_spill]] %s2901_s1 }
   0x3   :  { %2936 = sst [smem:[#allocation21_spill]] %s2902_s2 }
   0x4   :  { %2937 = sst [smem:[#allocation22_spill]] %s2903_s3 }
   0x5   :  { %2938 = sst [smem:[#allocation23_spill]] %s2904_s4 }
   0x6   :  { %2939 = sst [smem:[#allocation24_spill]] %s2905_s5 }
   0x7   :  { %2940 = sst [smem:[#allocation25_spill]] %s2906_s6 }
   0x8   :  { %2941 = sst [smem:[#allocation26_spill]] %s2908_s8 }
   0x9   :  { %2942 = sst [smem:[#allocation27_spill]] %s2911_s11 }
   0xa   :  { %2943 = sst [smem:[#allocation28_spill]] %s2915_s15 }
   0xb   :  { %2944 = sst [smem:[#allocation29_spill]] %s2916_s16 }
   0xc   :  { %2945 = sst [smem:[#allocation30_spill]] %s2917_s17 }
   0xd   :  { %2946 = sst [smem:[#allocation31_spill]] %s2918_s18 }
   0xe   :  { %23 = vsyncpa [#allocation4], 0 }
   0xf   :  { %25 = vsyncpa [#allocation4 + $0x1], 0  ;;  %s2523_s27 = smov 0   ;;  %s2525_s28 = smov 0  }
  0x10   :  { %s2527_s29 = smov 0   ;;  %s2529_s30 = smov 0  }
  0x11   :  { %s2531_s0 = smov 0   ;;  %s2533_s19 = smov 0  }
  0x12   :  { %s2535_s1 = smov 0   ;;  %s2537_s20 = smov 0  }
  0x13 LB: > { %2947 = sst [smem:[#allocation6_spill]] %s2396_s27  ;;  %s2002_s21 = sadd.s32 4294967295, %s2424_s20   ;;  %s2424_s20 = sphi %s2537_s20, %s31_s20   ;;  %s2420_s1 = sphi %s2535_s1, %s2999_s1   ;;  %s2416_s19 = sphi %s2533_s19, %s2998_s19   ;;  %s2412_s0 = sphi %s2531_s0, %s2997_s0   ;;  %s2408_s30 = sphi %s2529_s30, %s2996_s30   ;;  %s2404_s29 = sphi %s2527_s29, %s2995_s29   ;;  %s2400_s28 = sphi %s2525_s28, %s3001_s28   ;;  %s2396_s27 = sphi %s2523_s27, %s3000_s27  }
  0x14   : > { %2948 = sst [smem:[#allocation7_spill]] %s2404_s29  ;;  %s2003_s22 = sadd.s32 4294967294, %s2424_s20  }
  0x15   : > { %2949 = sst [smem:[#allocation8_spill]] %s2408_s30  ;;  %s40_s2 = sadd.s32 1, %s2416_s19 }
  0x16   : > { %2950 = sst [smem:[#allocation9_spill]] %s2412_s0  ;;  %p41_p0 = scmp.ge.s32.totalorder %s40_s2, 2 }
  0x17   : > { %2951 = sst [smem:[#allocation10_spill]] %s2416_s19  ;;  %s43_s23 = sadd.s32 1, %s2420_s1 }
  0x18   : > { %2952 = sst [smem:[#allocation11_spill]] %s2420_s1  ;;  %p508_p1 = scmp.ne.s32.totalorder %s2404_s29, %s2400_s28 }
  0x19   : > { %2953 = sst [smem:[#allocation12_spill]] %s2424_s20  ;;  %p509_p2 = scmp.eq.s32.totalorder %s2002_s21, 3 }
  0x1a   : > { %s3003_s2 = smov (%p41_p0, %s40_s2), 0  ;;  %s3005_s23 = smov (!%p41_p0, %s43_s23), %s2420_s1 }
  0x1b   : > { %2954 = sst [smem:[#allocation13_spill]] %s3003_s2  ;;  %p2572_p3 = por %p509_p2, %p508_p1 }
  0x1c   : > { %p514_p4 = scmp.ne.s32.totalorder %s2400_s28, %s2396_s27  ;;  %p45_p5 = scmp.ge.s32.totalorder %s3005_s23, 2 }
  0x1d   : > { %s2955_s24 = scalar_select %p2572_p3, 1, 0 }
  0x1e   : > { %p515_p6 = scmp.eq.s32.totalorder %s2003_s22, 3  ;;  %p2006_p7 = scmp.ge.s32.totalorder %s2424_s20, 1 }
  0x1f   : > { %2956 = sst [smem:[#allocation14_spill]] %s2955_s24  ;;  %p639_p8 = scmp.lt.s32.totalorder %s2424_s20, 5 }
  0x20   : > { %s3007_s23 = smov (%p45_p5, %s3005_s23), 0  ;;  %p2582_p9 = por %p515_p6, %p514_p4 }
  0x21   : > { %2957 = sst [smem:[#allocation15_spill]] %s3007_s23  ;;  %p640_p10 = pnand %p2006_p7, %p639_p8 }
  0x22   : > { %s2958_s25 = scalar_select %p2582_p9, 1, 0 }
  0x23   : > { %s495_s26 = ssub.s32 %s2420_s1, %s3007_s23  ;;  %s498_s21 = sadd.s32 1, %s2404_s29 }
  0x24   : > { %2959 = sst [smem:[#allocation16_spill]] %s2958_s25  ;;  %p496_p11 = scmp.eq.s32.totalorder %s495_s26, 0 }
  0x25   : > { %643 = sbr.rel (%p640_p10) target bundleno = 2160 (0x870), region = 92 }
  0x26   : > { %s2590_s2 = scalar_select %p496_p11, %s2404_s29, %s498_s21  }
  0x28   : > { %2960 = sst [smem:[#allocation17_spill]] %s2590_s2 }
  0x2a   : > { %p739_p12 = scmp.lt.s32.totalorder %s2412_s0, 1  ;;  %p746_p13 = scmp.lt.s32.totalorder %s2408_s30, 1 }
  0x2b   : > { %s2963_s27 = sld [smem:[#allocation19_spill]]  ;;  %s2970_s11 = sand.u32 1, %s2400_s28  }
  0x2c   : > { %s2596_s19 = scalar_select %p739_p12, %s2412_s0, 1 }
  0x2d   : > { %s2599_s25 = scalar_select %p746_p13, %s2408_s30, 1 }
  0x2e   : > { %2961 = sst [smem:[#allocation18_spill]] %s2596_s19  ;;  %s2007_s26 = sshll.u32 %s2596_s19, 3 }
  0x2f   : > { %s2203_s24 = smul.u32 192, %s2599_s25  ;;  %s2170_s0 = sshll.u32 %s2599_s25, 4 }
  0x30   : > { %s2204_s18 = smul.u32 12, %s2599_s25  ;;  %s2964_s4 = sld [smem:[#allocation23_spill]] }
  0x31   : > { %s742_s20 = scalar_lea.vmem %s2963_s27, %s2007_s26  ;;  %s2965_s6 = sld [smem:[#allocation25_spill]] }
  0x32   : > { %s2966_s5 = sld [smem:[#allocation24_spill]]  ;;  %s2172_s30 = sshll.u32 %s2599_s25, 5 }
  0x33   : > { %s2967_s8 = sld [smem:[#allocation26_spill]]  ;;  %s781_s19 = scalar_lea.vmem %s2912_s12, %s2599_s25 }
  0x34   : > { %s784_s26 = scalar_lea.vmem %s2913_s13, %s2599_s25  ;;  %s787_s15 = scalar_lea.vmem %s2914_s14, %s2599_s25 }
  0x36   : > { %s2615_s3 = scalar_lea.vmem %s2964_s4, %s2203_s24 }
  0x37   : > { %s2620_s23 = scalar_lea.vmem %s2965_s6, %s2170_s0  ;;  %s2969_s6 = sld [smem:[#allocation28_spill]] }
  0x38   : > { %s2625_s29 = scalar_lea.vmem %s2966_s5, %s2204_s18  ;;  %s2648_s5 = scalar_lea.vmem %s2910_s10, %s2172_s30 }
  0x39   : > { %s2634_s16 = scalar_lea.vmem %s2967_s8, %s2170_s0  ;;  %s2668_s18 = scalar_lea.vmem [#allocation3], %s2970_s11 }
  0x3a   : > { %s2971_s30 = sld [smem:[#allocation8_spill]] }
  0x3d   : > { %s790_s22 = scalar_lea.vmem %s2969_s6, %s2599_s25 }
  0x40   : > { %p2015_p0 = scmp.ne.s32.totalorder %s2971_s30, 0 }
  0x41   : > { %s2973_s2 = sld [smem:[#allocation22_spill]] (!%p2015_p0) }
  0x42   : > { %795 = sbr.rel (%p2015_p0) target bundleno = 341 (0x155), region = 96 }
  0x47   : > { %v796_v0 = vld [vmem:[%s742_s20] sm:$0xff]  ;;  %vm799_vm0 = vcmask 261120   ;;  %v2426_v2 = vmov 32.0   ;;  %s2972_s20 = sld [smem:[#allocation21_spill]] }
  0x48   : > { %v800_v1 = vsel %vm799_vm0, %v796_v0, 0.0  ;;  %2280 = vrcp.f32 %v2426_v2  ;;  %v2279_v25 = vld [vmem:[%s2973_s2] ss:$0 sm:$0xff] }
  0x49   : > { %801 = vadd.xlane.f32.xlu0 %v800_v1 }
  0x4d   : > { %v2278_v23 = vld [vmem:[%s2972_s20] ss:$0 sm:$0xff] }
  0x4e   : > { %v2281_v3 = vpop.eup %2280 }
  0x4f   : > { %v804_v4 = vmul.f32 32.0, %v2281_v3  ;;  %vm808_vm1 = vweird.f32 %v2281_v3 }
  0x51   : > { %v805_v5 = vsub.f32 1.0, %v804_v4 }
  0x53   : > { %v806_v6 = vmul.f32 %v2281_v3, %v805_v5 }
  0x55   : > { %v807_v7 = vadd.f32 %v2281_v3, %v806_v6 }
  0x57   : > { %v809_v8 = vsel %vm808_vm1, %v2281_v3, %v807_v7 }
  0xbc   : > { %v802_v9 = vpop.xlane.xlu0 %801 }
  0xbd   : > { %v810_v10 = vmul.f32 %v809_v8, %v802_v9 }
  0xbf   : > { %v811_v11 = vsub.f32 %v796_v0, %v810_v10 }
  0xc1   : > { %v812_v12 = vmul.f32 %v811_v11, %v811_v11 }
  0xc3   : > { %v813_v13 = vsel %vm799_vm0, %v812_v12, 0.0 }
  0xc4   : > { %814 = vadd.xlane.f32.xlu0 %v813_v13 }
 0x137   : > { %v815_v14 = vpop.xlane.xlu0 %814 }
 0x138   : > { %v816_v15 = vmul.f32 %v815_v14, %v809_v8 }
 0x13a   : > { %v817_v16 = vadd.f32 1e-12, %v816_v15 }
 0x13c   : > { %2282 = vrsqrt.f32 %v817_v16  ;;  %vm824_vm3 = vweird.f32 %v817_v16 }
 0x142   : > { %v2283_v17 = vpop.eup %2282 }
 0x143   : > { %v819_v18 = vmul.f32 %v2283_v17, %v817_v16  ;;  %vm825_vm2 = vweird.f32 %v2283_v17 }
 0x144   : > { %vm826_vm4 = vmor %vm824_vm3, %vm825_vm2 }
 0x145   : > { %v820_v19 = vmul.f32 %v2283_v17, %v819_v18 }
 0x147   : > { %v821_v20 = vmul.f32 0.5, %v820_v19 }
 0x149   : > { %v822_v21 = vsub.f32 1.5, %v821_v20 }
 0x14b   : > { %v823_v22 = vmul.f32 %v2283_v17, %v822_v21 }
 0x14d   : > { %v827_v24 = vsel %vm826_vm4, %v2283_v17, %v823_v22 }
 0x14e   : > { %v828_v26 = vmul.f32 %v827_v24, %v811_v11 }
 0x150   : > { %v832_v27 = vmul.f32 %v2278_v23, %v828_v26 }
 0x152   : > { %v836_v28 = vadd.f32 %v2279_v25, %v832_v27 }
 0x154   : > { %837 = vst.msk [vmem:[#allocation2] sm:$0xff] %vm799_vm0, %v836_v28 }
 0x155 PF: > { %v2174_v29 = vld [vmem:[%s2615_s3 + $0x8] sm:$0xff]  ;;  %v2176_v30 = vld [vmem:[%s2615_s3 + $0x18] sm:$0xff]  ;;  %v2173_v33 = vld [vmem:[%s2615_s3] sm:$0xff]  ;;  %vm948_vm5 = vcmask 261120   ;;  %vm1244_vm6 = vcmask 64512   ;;  %s2974_s0 = sld [smem:[#allocation18_spill]]  ;;  %s2978_s20 = scalar_lea.vmem %s2909_s9, %s2599_s25 }
 0x156   : > { %v2178_v31 = vld [vmem:[%s2615_s3 + $0x28] sm:$0xff]  ;;  %v2180_v32 = vld [vmem:[%s2615_s3 + $0x38] sm:$0xff]  ;;  %958 = vmatpush.bf16.msra.mxu0 %v2174_v29  ;;  %983 = vmatpush.bf16.msra.mxu1 %v2176_v30  ;;  %v2175_v34 = vld [vmem:[%s2615_s3 + $0x10] sm:$0xff]  ;;  %s2975_s24 = sld [smem:[#allocation20_spill]]  ;;  %vm1496_vm7 = vcmask 1043456   ;;  %vm1705_vm12 = vcmask 523264  }
 0x157   : > { %1008 = vmatpush.bf16.msra.mxu2 %v2178_v31  ;;  %1033 = vmatpush.bf16.msra.mxu3 %v2180_v32  ;;  %v2177_v36 = vld [vmem:[%s2615_s3 + $0x20] sm:$0xff]  ;;  %v2179_v37 = vld [vmem:[%s2615_s3 + $0x30] sm:$0xff]  ;;  %v2182_v38 = vld [vmem:[%s2615_s3 + $0x48] sm:$0xff]  ;;  %s2979_s21 = sld [smem:[#allocation27_spill]] }
 0x158   : > { %v2184_v39 = vld [vmem:[%s2615_s3 + $0x58] sm:$0xff]  ;;  %v2186_v41 = vld [vmem:[%s2615_s3 + $0x68] sm:$0xff]  ;;  %v2181_v43 = vld [vmem:[%s2615_s3 + $0x40] sm:$0xff] }
 0x159   : > { %v2188_v42 = vld [vmem:[%s2615_s3 + $0x78] sm:$0xff]  ;;  %v2183_v44 = vld [vmem:[%s2615_s3 + $0x50] sm:$0xff]  ;;  %v2185_v45 = vld [vmem:[%s2615_s3 + $0x60] sm:$0xff] }
 0x15a   : > { %959 = vmatpush.bf16.msra.mxu0 %v2173_v33  ;;  %984 = vmatpush.bf16.msra.mxu1 %v2175_v34  ;;  %v2187_v46 = vld [vmem:[%s2615_s3 + $0x70] sm:$0xff]  ;;  %v2194_v47 = vld [vmem:[%s2615_s3 + $0xa8] sm:$0xff]  ;;  %v2196_v48 = vld [vmem:[%s2615_s3 + $0xb8] sm:$0xff] }
 0x15b   : > { %v2686_v35 = vld [vmem:[#allocation2] sm:$0xff]  ;;  %1009 = vmatpush.bf16.msra.mxu2 %v2177_v36  ;;  %1034 = vmatpush.bf16.msra.mxu3 %v2179_v37  ;;  %v2195_v50 = vld [vmem:[%s2615_s3 + $0xb0] sm:$0xff]  ;;  %v2292_v19 = vld [vmem:[%s2625_s29 + $0xa] ss:$0 sm:$0xff] }
 0x15c   : > { %v2694_v40 = vpack.c.bf16 %v2686_v35, %v2686_v35  ;;  %v2193_v49 = vld [vmem:[%s2615_s3 + $0xa0] sm:$0xff]  ;;  %v2293_v22 = vld [vmem:[%s2625_s29 + $0xb] ss:$0 sm:$0xff]  ;;  %s2976_s4 = scalar_lea.vmem %s2975_s24, %s2974_s0 }
 0x15d   : > { %v2288_v57 = vld [vmem:[%s2625_s29 + $0x4] ss:$0 sm:$0xff]  ;;  %v2289_v58 = vld [vmem:[%s2625_s29 + $0x5] ss:$0 sm:$0xff]  ;;  %v2284_v61 = vld [vmem:[%s2625_s29] ss:$0 sm:$0xff]  ;;  %s2980_s27 = scalar_lea.vmem %s2979_s21, %s2599_s25 }
 0x15e   : > { %1058 = vmatpush.bf16.msrb.mxu0 %v2182_v38  ;;  %1083 = vmatpush.bf16.msrb.mxu1 %v2184_v39  ;;  %v2285_v62 = vld [vmem:[%s2625_s29 + $0x1] ss:$0 sm:$0xff]  ;;  %v2290_v5 = vld [vmem:[%s2625_s29 + $0x6] ss:$0 sm:$0xff]  ;;  %v2291_v6 = vld [vmem:[%s2625_s29 + $0x7] ss:$0 sm:$0xff] }
 0x15f   : > { %2024 = vmatmul.msk.bf16.vlgmr.msra.gmra.mxu0 %vm948_vm5, %v2694_v40  ;;  %2033 = vmatmul.msk.bf16.vlgmr.msra.gmra.mxu1 %vm948_vm5, %v2694_v40  ;;  %v2286_v9 = vld [vmem:[%s2625_s29 + $0x2] ss:$0 sm:$0xff]  ;;  %v2287_v10 = vld [vmem:[%s2625_s29 + $0x3] ss:$0 sm:$0xff]  ;;  %v2294_v27 = vld [vmem:[%s2976_s4] ss:$0 sm:$0xff] }
 0x160   : > { %2042 = vmatmul.msk.bf16.vlgmr.msra.gmra.mxu2 %vm948_vm5, %v2694_v40  ;;  %2051 = vmatmul.msk.bf16.vlgmr.msra.gmra.mxu3 %vm948_vm5, %v2694_v40  ;;  %s2982_s4 = sld [smem:[#allocation8_spill]] }
 0x161   : > { %1108 = vmatpush.bf16.msrb.mxu2 %v2186_v41  ;;  %1133 = vmatpush.bf16.msrb.mxu3 %v2188_v42  ;;  %v2190_v42 = vld [vmem:[%s2615_s3 + $0x88] sm:$0xff] }
 0x162   : > { %1059 = vmatpush.bf16.msrb.mxu0 %v2181_v43  ;;  %1084 = vmatpush.bf16.msrb.mxu1 %v2183_v44  ;;  %v2189_v43 = vld [vmem:[%s2615_s3 + $0x80] sm:$0xff]  ;;  %v2192_v44 = vld [vmem:[%s2615_s3 + $0x98] sm:$0xff] }
 0x165   : > { %1109 = vmatpush.bf16.msrb.mxu2 %v2185_v45  ;;  %1134 = vmatpush.bf16.msrb.mxu3 %v2187_v46  ;;  %v2191_v45 = vld [vmem:[%s2615_s3 + $0x90] sm:$0xff] }
 0x166   : > { %1158 = vmatpush.bf16.msra.mxu0 %v2190_v42  ;;  %1183 = vmatpush.bf16.msra.mxu1 %v2192_v44  ;;  %p2166_p1 = scmp.ne.s32.totalorder %s2982_s4, 1 }
 0x169   : > { %1208 = vmatpush.bf16.msra.mxu2 %v2194_v47  ;;  %1233 = vmatpush.bf16.msra.mxu3 %v2196_v48 }
 0x16a   : > { %1159 = vmatpush.bf16.msra.mxu0 %v2189_v43  ;;  %1184 = vmatpush.bf16.msra.mxu1 %v2191_v45 }
 0x16d   : > { %1209 = vmatpush.bf16.msra.mxu2 %v2193_v49  ;;  %1234 = vmatpush.bf16.msra.mxu3 %v2195_v50 }
 0x16f   : > { %2060 = vmatmul.msk.bf16.vlgmr.msrb.gmra.mxu0 %vm948_vm5, %v2694_v40  ;;  %2069 = vmatmul.msk.bf16.vlgmr.msrb.gmra.mxu1 %vm948_vm5, %v2694_v40 }
 0x170   : > { %2078 = vmatmul.msk.bf16.vlgmr.msrb.gmra.mxu2 %vm948_vm5, %v2694_v40  ;;  %2087 = vmatmul.msk.bf16.vlgmr.msrb.gmra.mxu3 %vm948_vm5, %v2694_v40 }
 0x17f   : > { %2096 = vmatmul.msk.bf16.vlgmr.msra.gmra.mxu0 %vm948_vm5, %v2694_v40  ;;  %2105 = vmatmul.msk.bf16.vlgmr.msra.gmra.mxu1 %vm948_vm5, %v2694_v40 }
 0x180   : > { %2114 = vmatmul.msk.bf16.vlgmr.msra.gmra.mxu2 %vm948_vm5, %v2694_v40  ;;  %2123 = vmatmul.msk.bf16.vlgmr.msra.gmra.mxu3 %vm948_vm5, %v2694_v40 }
 0x1dc   : > { %v961_v51 = vpop.f32.mrf.mxu0  ;;  %v986_v52 = vpop.f32.mrf.mxu1 }
 0x1dd   : > { %v962_v3 = vadd.f32 %v2284_v61, %v961_v51  ;;  %v987_v4 = vadd.f32 %v2285_v62, %v986_v52 }
 0x1e3   : > { %v1011_v53 = vpop.f32.mrf.mxu2  ;;  %v1036_v54 = vpop.f32.mrf.mxu3 }
 0x1e4   : > { %v963_v55 = vpop.f32.mrf.mxu0  ;;  %v988_v56 = vpop.f32.mrf.mxu1  ;;  %v1012_v15 = vadd.f32 %v2286_v9, %v1011_v53  ;;  %v1037_v16 = vadd.f32 %v2287_v10, %v1036_v54 }
 0x1eb   : > { %v1013_v59 = vpop.f32.mrf.mxu2  ;;  %v1038_v60 = vpop.f32.mrf.mxu3 }
 0x1ec   : > { %v1061_v63 = vpop.f32.mrf.mxu0  ;;  %v1086_v0 = vpop.f32.mrf.mxu1 }
 0x1ed   : > { %v1062_v1 = vadd.f32 %v2288_v57, %v1061_v63  ;;  %v1087_v2 = vadd.f32 %v2289_v58, %v1086_v0 }
 0x1ef   : > { %2124 = vmatpush.xpose.msk.msrb.mxu2 %vm1244_vm6, %v1062_v1  ;;  %2126 = vmatpush.xpose.msk.msrb.mxu3 %vm1244_vm6, %v1087_v2  ;;  %v2295_v1 = vld [vmem:[%s2625_s29 + $0x8] ss:$0 sm:$0xff] }
 0x1f2   : > { %2125 = vmatmul.msk.f32.vlgmr.msrb.gmra.mxu2 %vm1244_vm6, %v962_v3  ;;  %2127 = vmatmul.msk.f32.vlgmr.msrb.gmra.mxu3 %vm1244_vm6, %v987_v4  ;;  %v2296_v4 = vld [vmem:[%s2625_s29 + $0x9] ss:$0 sm:$0xff]  ;;  %s2977_s29 = scalar_lea.vmem %s2907_s7, %s2599_s25 }
 0x1f3   : > { %v1111_v7 = vpop.f32.mrf.mxu2  ;;  %v1136_v8 = vpop.f32.mrf.mxu3 }
 0x1f4   : > { %v1063_v11 = vpop.f32.mrf.mxu0  ;;  %v1088_v12 = vpop.f32.mrf.mxu1  ;;  %v1112_v13 = vadd.f32 %v2290_v5, %v1111_v7  ;;  %v1137_v14 = vadd.f32 %v2291_v6, %v1136_v8 }
 0x1f6   : > { %2128 = vmatpush.xpose.msk.msra.mxu2 %vm1244_vm6, %v1112_v13  ;;  %2130 = vmatpush.xpose.msk.msra.mxu3 %vm1244_vm6, %v1137_v14 }
 0x1fa   : > { %2129 = vmatmul.msk.f32.vlgmr.msra.gmra.mxu2 %vm1244_vm6, %v1012_v15  ;;  %2131 = vmatmul.msk.f32.vlgmr.msra.gmra.mxu3 %vm1244_vm6, %v1037_v16 }
 0x1fb   : > { %v1113_v17 = vpop.f32.mrf.mxu2  ;;  %v1138_v18 = vpop.f32.mrf.mxu3 }
 0x1fc   : > { %v1161_v2 = vpop.f32.mrf.mxu0  ;;  %v1186_v5 = vpop.f32.mrf.mxu1 }
 0x1fd   : > { %v1162_v3 = vadd.f32 %v2295_v1, %v1161_v2  ;;  %v1187_v7 = vadd.f32 %v2296_v4, %v1186_v5  ;;  %v2198_v4 = vld [vmem:[%s2634_s16 + $0x8] sm:$0xff]  ;;  %v2197_v5 = vld [vmem:[%s2634_s16] sm:$0xff] }
 0x1ff   : > { %1411 = vmatpush.msrb.mxu0 %v1162_v3  ;;  %1434 = vmatpush.msrb.mxu1 %v1187_v7 }
 0x203   : > { %v1211_v20 = vpop.f32.mrf.mxu2  ;;  %v1236_v23 = vpop.f32.mrf.mxu3 }
 0x204   : > { %v1212_v21 = vadd.f32 %v2292_v19, %v1211_v20  ;;  %v1237_v24 = vadd.f32 %v2293_v22, %v1236_v23  ;;  %v1163_v6 = vpop.f32.mrf.mxu0  ;;  %v1188_v8 = vpop.f32.mrf.mxu1  ;;  %v1490_v23 = vld [vmem:[%s2620_s23 + $0x4] sm:$0xf] }
 0x206   : > { %1457 = vmatpush.msrb.mxu2 %v1212_v21  ;;  %1480 = vmatpush.msrb.mxu3 %v1237_v24  ;;  %v1489_v21 = vld [vmem:[%s2620_s23] sm:$0xf]  ;;  %v1517_v24 = vsel %vm1496_vm7, %v1490_v23, 0  ;;  %v2201_v23 = vld [vmem:[%s2648_s5 + $0x10] sm:$0xff] }
 0x207   : > { %v1498_v22 = vsel %vm1496_vm7, %v1489_v21, 0  ;;  %1526 = vmatpush.bf16.msra.mxu1 %v1517_v24  ;;  %v2200_v24 = vld [vmem:[%s2648_s5 + $0x8] sm:$0xff] }
 0x208   : > { %1507 = vmatpush.bf16.msra.mxu0 %v1498_v22  ;;  %v2202_v22 = vld [vmem:[%s2648_s5 + $0x18] sm:$0xff] }
 0x20b   : > { %v1213_v25 = vpop.f32.mrf.mxu2  ;;  %v1238_v26 = vpop.f32.mrf.mxu3 }
 0x20c   : > { %v1491_v25 = vld [vmem:[%s2620_s23 + $0x8] sm:$0xf] }
 0x20d   : > { %v1536_v26 = vsel %vm1496_vm7, %v1491_v25, 0  ;;  %v2199_v25 = vld [vmem:[%s2648_s5] sm:$0xff] }
 0x20e   : > { %1545 = vmatpush.bf16.msra.mxu2 %v1536_v26  ;;  %v2300_v26 = vld [vmem:[%s2978_s20] ss:$0 sm:$0xff]  ;;  %s2985_s20 = sld [smem:[#allocation30_spill]] (!%p2166_p1) }
 0x275   : > { %v1268_v28 = vpop.f32.mrf.mxu2  ;;  %v1294_v30 = vpop.f32.mrf.mxu3 }
 0x276   : > { %v1269_v29 = vadd.f32 %v2294_v27, %v1268_v28  ;;  %v1295_v32 = vadd.f32 %v2294_v27, %v1294_v30 }
 0x278   : > { %v1349_v31 = vsel %vm1244_vm6, %v1269_v29, -inf  ;;  %v1352_v37 = vsel %vm1244_vm6, %v1295_v32, -inf }
 0x279   : > { %1350 = vmax.xlane.f32.xlu1 %v1349_v31 }
 0x27d   : > { %v1320_v33 = vpop.f32.mrf.mxu2  ;;  %v1346_v38 = vpop.f32.mrf.mxu3 }
 0x27e   : > { %v1321_v34 = vadd.f32 %v2294_v27, %v1320_v33  ;;  %v1347_v39 = vadd.f32 %v2294_v27, %v1346_v38  ;;  %v1492_v27 = vld [vmem:[%s2620_s23 + $0xc] sm:$0xf] }
 0x27f   : > { %v1555_v28 = vsel %vm1496_vm7, %v1492_v27, 0 }
 0x280   : > { %v1355_v36 = vsel %vm1244_vm6, %v1321_v34, -inf  ;;  %v1358_v41 = vsel %vm1244_vm6, %v1347_v39, -inf  ;;  %1564 = vmatpush.bf16.msra.mxu3 %v1555_v28 }
 0x281   : > { %1356 = vmax.xlane.f32.xlu0 %v1355_v36  ;;  %1353 = vmax.xlane.f32.xlu1 %v1352_v37 }
 0x289   : > { %1359 = vmax.xlane.f32.xlu0 %v1358_v41 }
 0x2ec   : > { %v1351_v46 = vpop.xlane.xlu1 %1350 }
 0x2ed   : > { %v1361_v47 = vsub.f32 %v1269_v29, %v1351_v46 }
 0x2ef   : > { %v1365_v48 = vmul.f32 1.442695, %v1361_v47 }
 0x2f1   : > { %2304 = vpow2.f32 %v1365_v48 }
 0x2f4   : > { %v1357_v49 = vpop.xlane.xlu0 %1356  ;;  %v1354_v50 = vpop.xlane.xlu1 %1353 }
 0x2f5   : > { %v1363_v51 = vsub.f32 %v1321_v34, %v1357_v49  ;;  %v1362_v52 = vsub.f32 %v1295_v32, %v1354_v50 }
 0x2f7   : > { %v2305_v53 = vpop.eup %2304  ;;  %v1369_v54 = vmul.f32 1.442695, %v1363_v51  ;;  %v1367_v55 = vmul.f32 1.442695, %v1362_v52  ;;  %v2297_v51 = vld [vmem:[%s2977_s29] ss:$0 sm:$0xff] }
 0x2f8   : > { %v1373_v56 = vsel %vm1244_vm6, %v2305_v53, 0.0  ;;  %s2983_s29 = sld [smem:[#allocation29_spill]] (!%p2166_p1) }
 0x2f9   : > { %2306 = vpow2.f32 %v1369_v54  ;;  %1374 = vadd.xlane.f32.xlu0 %v1373_v56 }
 0x2fa   : > { %2308 = vpow2.f32 %v1367_v55 }
 0x2fc   : > { %v1360_v57 = vpop.xlane.xlu0 %1359 }
 0x2fd   : > { %v1364_v58 = vsub.f32 %v1347_v39, %v1360_v57 }
 0x2fe   : > { %s2984_s6 = smov (!%p2166_p1), %s2983_s29 }
 0x2ff   : > { %v2307_v40 = vpop.eup %2306  ;;  %v1371_v59 = vmul.f32 1.442695, %v1364_v58  ;;  %v2427_v58 = vmov 32.0  }
 0x300   : > { %v2309_v60 = vpop.eup %2308  ;;  %v1379_v61 = vsel %vm1244_vm6, %v2307_v40, 0.0 }
 0x301   : > { %2310 = vpow2.f32 %v1371_v59  ;;  %1380 = vadd.xlane.f32.xlu2 %v1379_v61  ;;  %v1376_v62 = vsel %vm1244_vm6, %v2309_v60, 0.0 }
 0x302   : > { %1377 = vadd.xlane.f32.xlu1 %v1376_v62 }
 0x307   : > { %v2311_v63 = vpop.eup %2310 }
 0x308   : > { %v1382_v0 = vsel %vm1244_vm6, %v2311_v63, 0.0 }
 0x309   : > { %1383 = vadd.xlane.f32.xlu2 %v1382_v0 }
 0x36c   : > { %v1375_v9 = vpop.xlane.xlu0 %1374 }
 0x36d   : > { %2312 = vrcp.f32 %v1375_v9 }
 0x373   : > { %v2313_v10 = vpop.eup %2312 }
 0x374   : > { %v1389_v11 = vmul.f32 %v2313_v10, %v2305_v53  ;;  %v1381_v12 = vpop.xlane.xlu2 %1380 }
 0x375   : > { %2314 = vrcp.f32 %v1381_v12  ;;  %v1378_v13 = vpop.xlane.xlu1 %1377 }
 0x376   : > { %2316 = vrcp.f32 %v1378_v13  ;;  %2132 = vmatmul.msk.f32.vlgmr.msrb.gmra.mxu0 %vm1244_vm6, %v1389_v11 }
 0x377   : > { %1652 = vmatpush.bf16.msrb.mxu0 %v2198_v4 }
 0x37b   : > { %v2315_v14 = vpop.eup %2314  ;;  %1653 = vmatpush.bf16.msrb.mxu0 %v2197_v5 }
 0x37c   : > { %v2317_v15 = vpop.eup %2316  ;;  %v1391_v16 = vmul.f32 %v2315_v14, %v2307_v40  ;;  %v1384_v17 = vpop.xlane.xlu2 %1383 }
 0x37d   : > { %v1390_v18 = vmul.f32 %v2317_v15, %v2309_v60  ;;  %2318 = vrcp.f32 %v1384_v17  ;;  %v2298_v15 = vld [vmem:[%s781_s19] ss:$0 sm:$0xff] }
 0x37e   : > { %2134 = vmatmul.msk.f32.vlgmr.msrb.gmra.mxu2 %vm1244_vm6, %v1391_v16  ;;  %2320 = vrcp.f32 %v2427_v58  ;;  %v2299_v17 = vld [vmem:[%s784_s26] ss:$0 sm:$0xff] }
 0x37f   : > { %2133 = vmatmul.msk.f32.vlgmr.msrb.gmra.mxu1 %vm1244_vm6, %v1390_v18 }
 0x380   : > { %1713 = vmatpush.bf16.msrb.mxu1 %v2202_v22 }
 0x383   : > { %v2319_v19 = vpop.eup %2318 }
 0x384   : > { %v1392_v20 = vmul.f32 %v2319_v19, %v2311_v63  ;;  %v2321_v40 = vpop.eup %2320  ;;  %1714 = vmatpush.bf16.msrb.mxu1 %v2201_v23 }
 0x385   : > { %v1589_v59 = vmul.f32 32.0, %v2321_v40  ;;  %vm1593_vm8 = vweird.f32 %v2321_v40 }
 0x386   : > { %2135 = vmatmul.msk.f32.vlgmr.msrb.gmra.mxu3 %vm1244_vm6, %v1392_v20 }
 0x387   : > { %v1590_v60 = vsub.f32 1.0, %v1589_v59 }
 0x388   : > { %1715 = vmatpush.bf16.msrb.mxu1 %v2200_v24 }
 0x389   : > { %v1591_v61 = vmul.f32 %v2321_v40, %v1590_v60 }
 0x38b   : > { %v1592_v62 = vadd.f32 %v2321_v40, %v1591_v61  ;;  %v2302_v61 = vld [vmem:[%s787_s15] ss:$0 sm:$0xff] }
 0x38c   : > { %1716 = vmatpush.bf16.msrb.mxu1 %v2199_v25 }
 0x38d   : > { %v2790_v63 = vsel %vm1593_vm8, %v2321_v40, %v1592_v62 }
 0x3f3   : > { %v1413_v29 = vpop.f32.mrf.mxu0 }
 0x3f4   : > { %v1485_v30 = vpack.c.bf16 %v1413_v29, %v1413_v29 }
 0x3f6   : > { %2136 = vmatmul.msk.bf16.vlgmr.msra.gmra.mxu0 %vm1244_vm6, %v1485_v30 }
 0x3fc   : > { %v1436_v31 = vpop.f32.mrf.mxu1 }
 0x3fd   : > { %v1486_v32 = vpack.c.bf16 %v1436_v31, %v1436_v31 }
 0x3ff   : > { %2137 = vmatmul.msk.bf16.vlgmr.msra.gmra.mxu1 %vm1244_vm6, %v1486_v32 }
 0x401   : > { %v1459_v33 = vpop.f32.mrf.mxu2 }
 0x402   : > { %v1487_v34 = vpack.c.bf16 %v1459_v33, %v1459_v33 }
 0x404   : > { %2138 = vmatmul.msk.bf16.vlgmr.msra.gmra.mxu2 %vm1244_vm6, %v1487_v34 }
 0x409   : > { %v1482_v36 = vpop.f32.mrf.mxu3 }
 0x40a   : > { %v1488_v37 = vpack.c.bf16 %v1482_v36, %v1482_v36 }
 0x40c   : > { %2139 = vmatmul.msk.bf16.vlgmr.msra.gmra.mxu3 %vm1244_vm6, %v1488_v37 }
 0x473   : > { %v1509_v38 = vpop.f32.mrf.mxu0 }
 0x474   : > { %v1570_v45 = vsel %vm948_vm5, %v1509_v38, 0.0 }
 0x47b   : > { %v1511_v39 = vpop.f32.mrf.mxu0 }
 0x47c   : > { %v1528_v41 = vpop.f32.mrf.mxu1 }
 0x47d   : > { %v1571_v44 = vsel %vm948_vm5, %v1528_v41, 0.0 }
 0x47e   : > { %v1572_v47 = vadd.f32 %v1571_v44, %v1570_v45 }
 0x484   : > { %v1530_v42 = vpop.f32.mrf.mxu1 }
 0x485   : > { %v2301_v42 = vld [vmem:[%s2980_s27] ss:$0 sm:$0xff] }
 0x487   : > { %v1547_v43 = vpop.f32.mrf.mxu2 }
 0x488   : > { %v1573_v46 = vsel %vm948_vm5, %v1547_v43, 0.0 }
 0x489   : > { %v1574_v48 = vadd.f32 %v1573_v46, %v1572_v47 }
 0x48f   : > { %v1549_v49 = vpop.f32.mrf.mxu2  ;;  %v1566_v50 = vpop.f32.mrf.mxu3 }
 0x490   : > { %v1575_v52 = vsel %vm948_vm5, %v1566_v50, 0.0 }
 0x491   : > { %v1576_v53 = vadd.f32 %v1575_v52, %v1574_v48 }
 0x493   : > { %v1581_v54 = vadd.f32 %v2297_v51, %v1576_v53 }
 0x495   : > { %v1582_v55 = vadd.f32 %v1581_v54, %v2686_v35 }
 0x497   : > { %v1568_v56 = vpop.f32.mrf.mxu3  ;;  %v1585_v57 = vsel %vm948_vm5, %v1582_v55, 0.0 }
 0x498   : > { %1586 = vadd.xlane.f32.xlu2 %v1585_v57 }
 0x50b   : > { %v1587_v0 = vpop.xlane.xlu2 %1586 }
 0x50c   : > { %v1595_v1 = vmul.f32 %v2790_v63, %v1587_v0 }
 0x50e   : > { %v1596_v35 = vsub.f32 %v1582_v55, %v1595_v1 }
 0x510   : > { %v1597_v2 = vmul.f32 %v1596_v35, %v1596_v35 }
 0x512   : > { %v1598_v3 = vsel %vm948_vm5, %v1597_v2, 0.0 }
 0x513   : > { %1599 = vadd.xlane.f32.xlu0 %v1598_v3 }
 0x586   : > { %v1600_v6 = vpop.xlane.xlu0 %1599 }
 0x587   : > { %v1601_v7 = vmul.f32 %v1600_v6, %v2790_v63 }
 0x589   : > { %v1602_v8 = vadd.f32 1e-12, %v1601_v7 }
 0x58b   : > { %2322 = vrsqrt.f32 %v1602_v8  ;;  %vm1609_vm10 = vweird.f32 %v1602_v8 }
 0x591   : > { %v2323_v9 = vpop.eup %2322 }
 0x592   : > { %v1604_v10 = vmul.f32 %v2323_v9, %v1602_v8  ;;  %vm1610_vm9 = vweird.f32 %v2323_v9 }
 0x593   : > { %vm1611_vm11 = vmor %vm1609_vm10, %vm1610_vm9 }
 0x594   : > { %v1605_v11 = vmul.f32 %v2323_v9, %v1604_v10 }
 0x596   : > { %v1606_v12 = vmul.f32 0.5, %v1605_v11 }
 0x598   : > { %v1607_v13 = vsub.f32 1.5, %v1606_v12 }
 0x59a   : > { %v1608_v14 = vmul.f32 %v2323_v9, %v1607_v13 }
 0x59c   : > { %v1612_v16 = vsel %vm1611_vm11, %v2323_v9, %v1608_v14 }
 0x59d   : > { %v1613_v18 = vmul.f32 %v1612_v16, %v1596_v35 }
 0x59f   : > { %v1617_v19 = vmul.f32 %v2298_v15, %v1613_v18 }
 0x5a1   : > { %v1621_v20 = vadd.f32 %v2299_v17, %v1617_v19 }
 0x5a3   : > { %v1622_v21 = vpack.c.bf16 %v1621_v20, %v1621_v20 }
 0x5a5   : > { %2148 = vmatmul.msk.bf16.vlgmr.msrb.gmra.mxu0 %vm948_vm5, %v1622_v21 }
 0x622   : > { %v1655_v27 = vpop.f32.mrf.mxu0 }
 0x623   : > { %v1656_v28 = vadd.f32 %v2300_v26, %v1655_v27 }
 0x625   : > { %v1660_v29 = vmul.f32 0.044715, %v1656_v28  ;;  %v1659_v37 = vmul.f32 0.5, %v1656_v28 }
 0x627   : > { %v1661_v30 = vmul.f32 %v1660_v29, %v1656_v28 }
 0x629   : > { %v1662_v31 = vmul.f32 %v1661_v30, %v1656_v28 }
 0x62a   : > { %v1657_v32 = vpop.f32.mrf.mxu0 }
 0x62b   : > { %v1663_v33 = vadd.f32 %v1662_v31, %v1656_v28 }
 0x62d   : > { %v1664_v34 = vmul.f32 0.7978846, %v1663_v33 }
 0x62f   : > { %2324 = vtanh.f32 %v1664_v34 }
 0x635   : > { %v2325_v36 = vpop.eup %2324 }
 0x636   : > { %v1666_v38 = vadd.f32 1.0, %v2325_v36 }
 0x638   : > { %v1667_v39 = vmul.f32 %v1666_v38, %v1659_v37 }
 0x63a   : > { %v1668_v41 = vpack.c.bf16 %v1667_v39, %v1667_v39 }
 0x63c   : > { %2165 = vmatmul.msk.bf16.vlgmr.msrb.gmra.mxu1 %vm1705_vm12, %v1668_v41 }
 0x6b9   : > { %v1718_v43 = vpop.f32.mrf.mxu1 }
 0x6ba   : > { %v1719_v44 = vadd.f32 %v2301_v42, %v1718_v43 }
 0x6bc   : > { %v1722_v45 = vadd.f32 %v1719_v44, %v1621_v20 }
 0x6be   : > { %v1725_v46 = vsel %vm948_vm5, %v1722_v45, 0.0 }
 0x6bf   : > { %1726 = vadd.xlane.f32.xlu1 %v1725_v46 }
 0x6c1   : > { %v1720_v47 = vpop.f32.mrf.mxu1 }
 0x732   : > { %v1727_v48 = vpop.xlane.xlu1 %1726 }
 0x733   : > { %v1728_v49 = vmul.f32 %v1727_v48, %v2790_v63 }
 0x735   : > { %v1729_v50 = vsub.f32 %v1722_v45, %v1728_v49 }
 0x737   : > { %v1730_v51 = vmul.f32 %v1729_v50, %v1729_v50 }
 0x739   : > { %v1731_v52 = vsel %vm948_vm5, %v1730_v51, 0.0 }
 0x73a   : > { %1732 = vadd.xlane.f32.xlu2 %v1731_v52 }
 0x7ad   : > { %v1733_v53 = vpop.xlane.xlu2 %1732 }
 0x7ae   : > { %v1734_v54 = vmul.f32 %v1733_v53, %v2790_v63  ;;  %v2303_v63 = vld [vmem:[%s790_s22] ss:$0 sm:$0xff] }
 0x7b0   : > { %v1735_v55 = vadd.f32 1e-12, %v1734_v54 }
 0x7b2   : > { %2326 = vrsqrt.f32 %v1735_v55  ;;  %vm1742_vm14 = vweird.f32 %v1735_v55 }
 0x7b8   : > { %v2327_v56 = vpop.eup %2326 }
 0x7b9   : > { %v1737_v57 = vmul.f32 %v2327_v56, %v1735_v55  ;;  %vm1743_vm13 = vweird.f32 %v2327_v56 }
 0x7ba   : > { %vm1744_vm15 = vmor %vm1742_vm14, %vm1743_vm13 }
 0x7bb   : > { %v1738_v58 = vmul.f32 %v2327_v56, %v1737_v57 }
 0x7bd   : > { %v1739_v40 = vmul.f32 0.5, %v1738_v58 }
 0x7bf   : > { %v1740_v59 = vsub.f32 1.5, %v1739_v40 }
 0x7c1   : > { %v1741_v60 = vmul.f32 %v2327_v56, %v1740_v59 }
 0x7c3   : > { %v1745_v62 = vsel %vm1744_vm15, %v2327_v56, %v1741_v60 }
 0x7c4   : > { %v1746_v0 = vmul.f32 %v1745_v62, %v1729_v50 }
 0x7c6   : > { %v1750_v1 = vmul.f32 %v2302_v61, %v1746_v0  ;;  %1759 = sbr.rel (%p2166_p1) target bundleno = 2139 (0x85b), region = 100 }
 0x7c8   : > { %v1754_v35 = vadd.f32 %v2303_v63, %v1750_v1 }
 0x7ca   : > { %1755 = vst.msk [vmem:[#allocation2] sm:$0xff] %vm948_vm5, %v1754_v35 }
 0x7cb   : > { %v1763_v2 = vld [vmem:[%s2983_s29 + $0x18] sm:$0xff]  ;;  %v1762_v3 = vld [vmem:[%s2984_s6 + $0x10] sm:$0xff]  ;;  %v1761_v4 = vld [vmem:[%s2984_s6 + $0x8] sm:$0xff]  ;;  %vm1789_vm0 = vcmask 253952  }
 0x7cc   : > { %1780 = vmatpush.msra.mxu0 %v1763_v2  ;;  %v1760_v5 = vld [vmem:[%s2984_s6] sm:$0xff] }
 0x7cd   : > { %v1764_v6 = vld [vmem:[%s2985_s20] sm:$0x1] }
 0x7ce   : > { %1781 = vmatpush.msra.mxu0 %v1762_v3 }
 0x7d0   : > { %1782 = vmatpush.msra.mxu0 %v1761_v4 }
 0x7d2   : > { %1783 = vmatpush.msra.mxu0 %v1760_v5 }
 0x7d3   : > { %2167 = vmatmul.msk.f32.vlgmr.msra.gmra.mxu0 %vm948_vm5, %v1754_v35 }
 0x850   : > { %v1785_v7 = vpop.f32.mrf.mxu0 }
 0x851   : > { %v1786_v8 = vadd.f32 %v1785_v7, %v1764_v6 }
 0x853   : > { %2328 = vtanh.f32 %v1786_v8 }
 0x859   : > { %v2329_v9 = vpop.eup %2328 }
 0x85a   : > { %1790 = vst.msk [vmem:[%s2668_s18] sm:$0x1] %vm1789_vm0, %v2329_v9 }
 0x85b PF: > { %s2986_s5 = sld [smem:[#allocation9_spill]]  ;;  %s1802_s17 = sshll.u32 %s2668_s18, 4  ;;  %s1803_s17 = int_to_ptr.vmem [resolvable:$true] %s1802_s17 }
 0x85c   : > { %s2987_s27 = sld [smem:[#allocation31_spill]]  ;;  %s2990_s4 = sand.u32 1, %s2400_s28  }
 0x85d   : > { %s1792_s3 = scalar_lea.sflag [#allocation4], %s2990_s4 }
 0x862   : > { %s2988_s2 = smov %s2987_s27  ;;  %s1800_s1 = scalar_lea.hbm %s2987_s27, %s2986_s5 }
 0x863   : > { %s1804_s24 = sshll.u32 %s1800_s1, 4  ;;  %s2350_s25 = scalar_lea.hbm %s2988_s2, 2  ;;  %s1805_s24 = int_to_ptr.hbm [resolvable:$true] %s1804_s24 }
 0x864   : > { %s2344_s23 = sshra.s32 %s1805_s24, 4  ;;  %s2345_s23 = int_to_ptr.hbm [resolvable:$true] %s2344_s23 }
 0x865   : > { %s2346_s29 = scalar_lea.hbm %s2345_s23, 1  ;;  %p2351_p6 = scmp.lt.s32.totalorder %s2345_s23, %s2988_s2 }
 0x866   : > { %p2347_p2 = scmp.ne.s32.totalorder %s2345_s23, %s2346_s29  ;;  %p2352_p7 = scmp.lt.s32.totalorder %s2350_s25, %s2346_s29 }
 0x868   : > { %p2348_p4 = pnand %p2347_p2, %p2572_p3  ;;  %p2353_p8 = por %p2352_p7, %p2351_p6 }
 0x86a   : > { %p2349_p5 = pneg %p2348_p4 }
 0x86c   : > { %p2354_p10 = pnand %p2353_p8, %p2349_p5 }
 0x86e   : > { %2357 = shalt.err (!%p2354_p10)
}
 0x86f   : > { %2205 = dma.vmem_to_hbm [thread:$0]  (%p2572_p3), %s1803_s17, 16, %s1805_s24, %s1792_s3  }
 0x870 PF: > { %s2991_s18 = sld [smem:[#allocation12_spill]] }
 0x871   : > { %s2992_s8 = sld [smem:[#allocation6_spill]] }
 0x876   : > { %p2211_p11 = scmp.ge.s32.totalorder %s2991_s18, 2 }
 0x877   : > { %s1816_s11 = sand.u32 1, %s2992_s8  }
 0x878   : > { %p2208_p12 = pnand %p2211_p11, %p2582_p9  ;;  %s1817_s20 = scalar_lea.sflag [#allocation4], %s1816_s11 }
 0x87a   : > { %p2209_p13 = pneg %p2208_p12 }
 0x87c   : > { %2391 = dma.done.wait (%p2209_p13), %s1817_s20, 16  }
 0x87d   : > { %2393 = vsyncadd (%p2209_p13), %s1817_s20, 4294967280  ;;  %s31_s20 = sadd.s32 1, %s2991_s18   ;;  %s2994_s5 = sld [smem:[#allocation7_spill]] }
 0x87e   : > { %p28_p0 = scmp.ge.s32.totalorder %s31_s20, 6   ;;  %s2995_s29 = sld [smem:[#allocation17_spill]] }
 0x87f   : > { %s2996_s30 = sld [smem:[#allocation10_spill]]  ;;  %s3000_s27 = smov %s2400_s28 }
 0x880   : > { %s2997_s0 = sld [smem:[#allocation11_spill]]  ;;  %30 = sbr.rel (!%p28_p0) target bundleno = 19 (0x13), region = 174 }
 0x881   : > { %s2998_s19 = sld [smem:[#allocation13_spill]] }
 0x882   : > { %s2999_s1 = sld [smem:[#allocation15_spill]] }
 0x883   : > { %s3001_s28 = smov %s2994_s5 }
 0x885   :  { %1822 = vsyncpa [#allocation4], 1 }
 0x886   :  { %1824 = vsyncpa [#allocation4 + $0x1], 1 }

</bundles_post_ra>
